<compile_context>
chip_gen: v7x
topology: tpu7x:2x2x1
jax: 0.10.0
libtpu: 0.0.40
codegen_flags: <defaults>
</compile_context>

<pallas_src>
import math

import jax
import jax.numpy as jnp
from jax import lax
from jax.experimental import pallas as pl
from jax.experimental.pallas import tpu as pltpu

# ---------------- config (synthetic small RoBERTa) ----------------
B, S, H, NH, INTER, LAYERS, VOCAB = 2, 8, 32, 4, 64, 2, 128
DH = H // NH
MAX_POS = 64
PAD_IDX = 1          # RoBERTa padding_idx
LN_EPS = 1e-5
_SCALE = 1.0 / math.sqrt(DH)
_INV_SQRT2 = 1.0 / math.sqrt(2.0)

# -- packed weight-matrix slab: per layer all matrices have H rows (wo2 stored transposed)
C_QKV = 0                      # (H, 3H)   cols   0: 96
C_WO = 3 * H                   # (H, H)    cols  96:128
C_WI = 4 * H                   # (H, INTER)cols 128:192
C_WO2T = 4 * H + INTER         # (H, INTER)cols 192:256   (= wo2.T)
W_COLS = 4 * H + 2 * INTER     # 256  -> exactly two 128-lane tiles

# -- packed bias / LayerNorm vector slab (one padded 128-lane row per vector)
R_EMB_LN_G, R_EMB_LN_B = 0, 1
V_PER_LAYER = 8                # bqkv, bo, ln1_g, ln1_b, bi, bo2, ln2_g, ln2_b
V_ROWS = 2 + LAYERS * V_PER_LAYER
V_LANES = 128


# ---------------- in-kernel helpers (f32 math) ----------------
def _layernorm(x, g, b):
    mean = jnp.mean(x, axis=-1, keepdims=True)
    xc = x - mean
    var = jnp.mean(xc * xc, axis=-1, keepdims=True)
    return xc * lax.rsqrt(var + LN_EPS) * g + b


def _gelu(x):
    # exact (erf-based) GELU as in HF RoBERTa ("gelu"); not on the critical path here.
    return 0.5 * x * (1.0 + lax.erf(x * _INV_SQRT2))


# ---------------- single fused forward kernel ----------------
def _encoder_kernel(ids_ref,                       # (B, S) int32, SMEM (scalar prefetch)
                    word_emb_ref,                  # (VOCAB, H) f32
                    pos_type_ref,                  # (S, H) f32 (pos_emb slice + type_emb)
                    wslab_ref,                     # (LAYERS, H, W_COLS) f32
                    vslab_ref,                     # (V_ROWS, V_LANES) f32
                    cls_ref,                       # (B, H) f32 output
                    ctx_ref):                      # (B*S, H) f32 VMEM scratch

    def vrow(r, n):
        return vslab_ref[r:r + 1, 0:n]             # (1, n) bias / LN vector

    # ---- fused embedding: one-hot token gather as a single MXU pass ----
    iota = lax.broadcasted_iota(jnp.int32, (1, VOCAB), 1)
    onehot_rows = []
    for b in range(B):
        for s in range(S):
            onehot_rows.append((iota == ids_ref[b, s]).astype(jnp.float32))
    onehot = jnp.concatenate(onehot_rows, axis=0)                    # (B*S, VOCAB)
    x = jnp.dot(onehot, word_emb_ref[...],
                preferred_element_type=jnp.float32)                  # (B*S, H)
    x = x + jnp.concatenate([pos_type_ref[...]] * B, axis=0)         # + pos + token-type
    x = _layernorm(x, vrow(R_EMB_LN_G, H), vrow(R_EMB_LN_B, H))

    for li in range(LAYERS):                       # static unroll (LAYERS == 2)
        base = 2 + li * V_PER_LAYER
        w_l = wslab_ref[li]                        # (H, W_COLS) weight slab of this layer

        # ---- fused QKV projection: one (B*S,H)@(H,3H) MXU pass ----
        qkv = jnp.dot(x, w_l[:, C_QKV:C_QKV + 3 * H],
                      preferred_element_type=jnp.float32) + vrow(base + 0, 3 * H)

        # ---- self-attention: all (batch, head) score tiles stacked on sublanes ----
        scores = []
        for b in range(B):
            r0 = b * S
            for h in range(NH):
                lo = h * DH
                q_bh = qkv[r0:r0 + S, lo:lo + DH]
                k_bh = qkv[r0:r0 + S, H + lo:H + lo + DH]
                scores.append(lax.dot_general(     # q @ k.T without explicit transpose
                    q_bh, k_bh, (((1,), (1,)), ((), ())),
                    preferred_element_type=jnp.float32) * _SCALE)
        scores = jnp.concatenate(scores, axis=0)                     # (B*NH*S, S)
        # softmax statistics computed once for every head/batch; exact divide
        scores = scores - jnp.max(scores, axis=-1, keepdims=True)
        p = jnp.exp(scores)
        p = p / jnp.sum(p, axis=-1, keepdims=True)

        # per-head context written straight into VMEM scratch (no head concat)
        for b in range(B):
            r0 = b * S
            for h in range(NH):
                lo = h * DH
                pr = (b * NH + h) * S
                v_bh = qkv[r0:r0 + S, 2 * H + lo:2 * H + lo + DH]
                ctx_ref[r0:r0 + S, lo:lo + DH] = jnp.dot(
                    p[pr:pr + S, :], v_bh, preferred_element_type=jnp.float32)

        # ---- attention output projection + residual + LayerNorm ----
        attn_out = jnp.dot(ctx_ref[...], w_l[:, C_WO:C_WO + H],
                           preferred_element_type=jnp.float32) + vrow(base + 1, H)
        x = _layernorm(attn_out + x, vrow(base + 2, H), vrow(base + 3, H))

        # ---- FFN (GELU) + residual + LayerNorm ----
        inter = jnp.dot(x, w_l[:, C_WI:C_WI + INTER],
                        preferred_element_type=jnp.float32) + vrow(base + 4, INTER)
        inter = _gelu(inter)
        ffn = lax.dot_general(                     # inter @ wo2 (wo2 stored transposed)
            inter, w_l[:, C_WO2T:C_WO2T + INTER], (((1,), (1,)), ((), ())),
            preferred_element_type=jnp.float32) + vrow(base + 5, H)
        x = _layernorm(ffn + x, vrow(base + 6, H), vrow(base + 7, H))

    # <s> (CLS) token representation of every batch element in a single (B, H) store.
    cls_ref[...] = jnp.concatenate(
        [x[b * S:b * S + 1, :] for b in range(B)], axis=0).astype(cls_ref.dtype)


def fused_encoder(input_ids, p):
    grid_spec = pltpu.PrefetchScalarGridSpec(
        num_scalar_prefetch=1,                     # input_ids -> SMEM
        grid=(1,),                                 # one step: whole forward, one launch
        in_specs=[
            pl.BlockSpec((VOCAB, H), lambda i, ids: (0, 0)),
            pl.BlockSpec((S, H), lambda i, ids: (0, 0)),
            pl.BlockSpec((LAYERS, H, W_COLS), lambda i, ids: (0, 0, 0)),
            pl.BlockSpec((V_ROWS, V_LANES), lambda i, ids: (0, 0)),
        ],
        out_specs=pl.BlockSpec((B, H), lambda i, ids: (0, 0)),
        scratch_shapes=[pltpu.VMEM((B * S, H), jnp.float32)],
    )
    return pl.pallas_call(
        _encoder_kernel,
        out_shape=jax.ShapeDtypeStruct((B, H), jnp.float32),
        grid_spec=grid_spec,
        compiler_params=pltpu.CompilerParams(dimension_semantics=("arbitrary",)),
    )(input_ids, p["word_emb"], p["pos_type"], p["wslab"], p["vslab"])


# ---------------- parameter init (deterministic, synthetic) ----------------
def init_params(key):
    def normal(k, shape):
        return 0.02 * jax.random.normal(k, shape, dtype=jnp.float32)

    keys = jax.random.split(key, 4 + LAYERS)
    params = {
        "word_emb": normal(keys[0], (VOCAB, H)),
        "pos_emb": normal(keys[1], (MAX_POS, H)),
        "type_emb": normal(keys[2], (1, H)),
        "emb_ln_g": jnp.ones((H,), jnp.float32),
        "emb_ln_b": jnp.zeros((H,), jnp.float32),
        "layers": [],
    }
    for li in range(LAYERS):
        lk = jax.random.split(keys[4 + li], 6)
        params["layers"].append(
            {
                "wq": normal(lk[0], (H, H)), "bq": jnp.zeros((H,), jnp.float32),
                "wk": normal(lk[1], (H, H)), "bk": jnp.zeros((H,), jnp.float32),
                "wv": normal(lk[2], (H, H)), "bv": jnp.zeros((H,), jnp.float32),
                "wo": normal(lk[3], (H, H)), "bo": jnp.zeros((H,), jnp.float32),
                "ln1_g": jnp.ones((H,), jnp.float32), "ln1_b": jnp.zeros((H,), jnp.float32),
                "wi": normal(lk[4], (H, INTER)), "bi": jnp.zeros((INTER,), jnp.float32),
                "wo2": normal(lk[5], (INTER, H)), "bo2": jnp.zeros((H,), jnp.float32),
                "ln2_g": jnp.ones((H,), jnp.float32), "ln2_b": jnp.zeros((H,), jnp.float32),
            }
        )
    return params


def pack_params(params):
    """Pack all weights into 2 lane-dense VMEM slabs (+ embedding tables), all f32."""
    layers = params["layers"]

    def pad_row(v):
        return jnp.pad(v, (0, V_LANES - v.shape[0]))

    # (LAYERS, H, 256):  wqkv | wo | wi | wo2^T
    wslab = jnp.stack([
        jnp.concatenate(
            [l["wq"], l["wk"], l["wv"], l["wo"], l["wi"], l["wo2"].T], axis=1)
        for l in layers
    ])

    # (V_ROWS, 128): emb LN params then, per layer, bqkv, bo, ln1, bi, bo2, ln2
    vrows = [pad_row(params["emb_ln_g"]), pad_row(params["emb_ln_b"])]
    for l in layers:
        vrows += [
            pad_row(jnp.concatenate([l["bq"], l["bk"], l["bv"]])),
            pad_row(l["bo"]), pad_row(l["ln1_g"]), pad_row(l["ln1_b"]),
            pad_row(l["bi"]), pad_row(l["bo2"]), pad_row(l["ln2_g"]), pad_row(l["ln2_b"]),
        ]
    vslab = jnp.stack(vrows)

    # RoBERTa position ids for an all-ones mask: arange(1, S+1) + padding_idx.
    position_ids = jnp.arange(1, S + 1, dtype=jnp.int32) + PAD_IDX
    pos_type = params["pos_emb"][position_ids] + params["type_emb"][0][None, :]   # (S, H)

    return {
        "word_emb": params["word_emb"],   # (VOCAB, H) f32
        "pos_type": pos_type,             # (S, H) f32
        "wslab": wslab,                   # (LAYERS, H, 256) f32
        "vslab": vslab,                   # (V_ROWS, 128) f32
    }


# ---------------- forward (== TextLanguageModel.forward) ----------------
@jax.jit
def text_language_model_forward(packed, input_ids):
    # RobertaModel(...) -> last_hidden_state[:, 0, :] (<s> / CLS token), fully in-kernel.
    return fused_encoder(input_ids, packed)


if __name__ == "__main__":
    key = jax.random.PRNGKey(0)
    pkey, dkey = jax.random.split(key)
    params = init_params(pkey)
    packed = pack_params(params)

    # input_ids: <s> token (id 0) first, rest random "real" tokens (ids >= 3)
    body = jax.random.randint(dkey, (B, S - 1), 3, VOCAB, dtype=jnp.int32)
    input_ids = jnp.concatenate([jnp.zeros((B, 1), dtype=jnp.int32), body], axis=1)

    out = text_language_model_forward(packed, input_ids)
    out = jax.block_until_ready(out)
    assert out.shape == (B, H) and out.dtype == jnp.float32
    print("KERNEL_OK")
</pallas_src>

<mosaic_0001>
module attributes {stable_mosaic.version = 11 : i64} {
  func.func @_encoder_kernel(%arg0: i32, %arg1: memref<2x8xi32, #tpu.memory_space<smem>>, %arg2: memref<128x32xf32, #tpu.memory_space<vmem>>, %arg3: memref<8x32xf32, #tpu.memory_space<vmem>>, %arg4: memref<2x32x256xf32, #tpu.memory_space<vmem>>, %arg5: memref<18x128xf32, #tpu.memory_space<vmem>>, %arg6: memref<2x32xf32, #tpu.memory_space<vmem>>, %arg7: memref<16x32xf32, #tpu.memory_space<vmem>>) attributes {dimension_semantics = [#tpu.dimension_semantics<arbitrary>], iteration_bounds = array<i64: 1>, scalar_prefetch = 1 : i64, scratch_operands = 1 : i64, tpu.core_type = #tpu.core_type<tc>, window_params = [{pipeline_mode = #tpu.pipeline_mode<synchronous>, transform_indices = @transform_0, window_bounds = array<i64: 128, 32>}, {pipeline_mode = #tpu.pipeline_mode<synchronous>, transform_indices = @transform_1, window_bounds = array<i64: 8, 32>}, {pipeline_mode = #tpu.pipeline_mode<synchronous>, transform_indices = @transform_2, window_bounds = array<i64: 2, 32, 256>}, {pipeline_mode = #tpu.pipeline_mode<synchronous>, transform_indices = @transform_3, window_bounds = array<i64: 18, 128>}, {pipeline_mode = #tpu.pipeline_mode<synchronous>, transform_indices = @transform_4, window_bounds = array<i64: 2, 32>}]} {
    %0 = tpu.iota {dimensions = array<i32: 1>} : vector<1x128xi32>
    %c0 = arith.constant 0 : index
    %c0_0 = arith.constant 0 : index
    %1 = memref.load %arg1[%c0, %c0_0] : memref<2x8xi32, #tpu.memory_space<smem>>
    %2 = vector.broadcast %1 : i32 to vector<1x128xi32>
    %3 = arith.cmpi eq, %0, %2 : vector<1x128xi32>
    %4 = arith.extui %3 : vector<1x128xi1> to vector<1x128xi32>
    %5 = arith.sitofp %4 : vector<1x128xi32> to vector<1x128xf32>
    %c0_1 = arith.constant 0 : index
    %c1 = arith.constant 1 : index
    %6 = memref.load %arg1[%c0_1, %c1] : memref<2x8xi32, #tpu.memory_space<smem>>
    %7 = vector.broadcast %6 : i32 to vector<1x128xi32>
    %8 = arith.cmpi eq, %0, %7 : vector<1x128xi32>
    %9 = arith.extui %8 : vector<1x128xi1> to vector<1x128xi32>
    %10 = arith.sitofp %9 : vector<1x128xi32> to vector<1x128xf32>
    %c0_2 = arith.constant 0 : index
    %c2 = arith.constant 2 : index
    %11 = memref.load %arg1[%c0_2, %c2] : memref<2x8xi32, #tpu.memory_space<smem>>
    %12 = vector.broadcast %11 : i32 to vector<1x128xi32>
    %13 = arith.cmpi eq, %0, %12 : vector<1x128xi32>
    %14 = arith.extui %13 : vector<1x128xi1> to vector<1x128xi32>
    %15 = arith.sitofp %14 : vector<1x128xi32> to vector<1x128xf32>
    %c0_3 = arith.constant 0 : index
    %c3 = arith.constant 3 : index
    %16 = memref.load %arg1[%c0_3, %c3] : memref<2x8xi32, #tpu.memory_space<smem>>
    %17 = vector.broadcast %16 : i32 to vector<1x128xi32>
    %18 = arith.cmpi eq, %0, %17 : vector<1x128xi32>
    %19 = arith.extui %18 : vector<1x128xi1> to vector<1x128xi32>
    %20 = arith.sitofp %19 : vector<1x128xi32> to vector<1x128xf32>
    %c0_4 = arith.constant 0 : index
    %c4 = arith.constant 4 : index
    %21 = memref.load %arg1[%c0_4, %c4] : memref<2x8xi32, #tpu.memory_space<smem>>
    %22 = vector.broadcast %21 : i32 to vector<1x128xi32>
    %23 = arith.cmpi eq, %0, %22 : vector<1x128xi32>
    %24 = arith.extui %23 : vector<1x128xi1> to vector<1x128xi32>
    %25 = arith.sitofp %24 : vector<1x128xi32> to vector<1x128xf32>
    %c0_5 = arith.constant 0 : index
    %c5 = arith.constant 5 : index
    %26 = memref.load %arg1[%c0_5, %c5] : memref<2x8xi32, #tpu.memory_space<smem>>
    %27 = vector.broadcast %26 : i32 to vector<1x128xi32>
    %28 = arith.cmpi eq, %0, %27 : vector<1x128xi32>
    %29 = arith.extui %28 : vector<1x128xi1> to vector<1x128xi32>
    %30 = arith.sitofp %29 : vector<1x128xi32> to vector<1x128xf32>
    %c0_6 = arith.constant 0 : index
    %c6 = arith.constant 6 : index
    %31 = memref.load %arg1[%c0_6, %c6] : memref<2x8xi32, #tpu.memory_space<smem>>
    %32 = vector.broadcast %31 : i32 to vector<1x128xi32>
    %33 = arith.cmpi eq, %0, %32 : vector<1x128xi32>
    %34 = arith.extui %33 : vector<1x128xi1> to vector<1x128xi32>
    %35 = arith.sitofp %34 : vector<1x128xi32> to vector<1x128xf32>
    %c0_7 = arith.constant 0 : index
    %c7 = arith.constant 7 : index
    %36 = memref.load %arg1[%c0_7, %c7] : memref<2x8xi32, #tpu.memory_space<smem>>
    %37 = vector.broadcast %36 : i32 to vector<1x128xi32>
    %38 = arith.cmpi eq, %0, %37 : vector<1x128xi32>
    %39 = arith.extui %38 : vector<1x128xi1> to vector<1x128xi32>
    %40 = arith.sitofp %39 : vector<1x128xi32> to vector<1x128xf32>
    %c1_8 = arith.constant 1 : index
    %c0_9 = arith.constant 0 : index
    %41 = memref.load %arg1[%c1_8, %c0_9] : memref<2x8xi32, #tpu.memory_space<smem>>
    %42 = vector.broadcast %41 : i32 to vector<1x128xi32>
    %43 = arith.cmpi eq, %0, %42 : vector<1x128xi32>
    %44 = arith.extui %43 : vector<1x128xi1> to vector<1x128xi32>
    %45 = arith.sitofp %44 : vector<1x128xi32> to vector<1x128xf32>
    %c1_10 = arith.constant 1 : index
    %c1_11 = arith.constant 1 : index
    %46 = memref.load %arg1[%c1_10, %c1_11] : memref<2x8xi32, #tpu.memory_space<smem>>
    %47 = vector.broadcast %46 : i32 to vector<1x128xi32>
    %48 = arith.cmpi eq, %0, %47 : vector<1x128xi32>
    %49 = arith.extui %48 : vector<1x128xi1> to vector<1x128xi32>
    %50 = arith.sitofp %49 : vector<1x128xi32> to vector<1x128xf32>
    %c1_12 = arith.constant 1 : index
    %c2_13 = arith.constant 2 : index
    %51 = memref.load %arg1[%c1_12, %c2_13] : memref<2x8xi32, #tpu.memory_space<smem>>
    %52 = vector.broadcast %51 : i32 to vector<1x128xi32>
    %53 = arith.cmpi eq, %0, %52 : vector<1x128xi32>
    %54 = arith.extui %53 : vector<1x128xi1> to vector<1x128xi32>
    %55 = arith.sitofp %54 : vector<1x128xi32> to vector<1x128xf32>
    %c1_14 = arith.constant 1 : index
    %c3_15 = arith.constant 3 : index
    %56 = memref.load %arg1[%c1_14, %c3_15] : memref<2x8xi32, #tpu.memory_space<smem>>
    %57 = vector.broadcast %56 : i32 to vector<1x128xi32>
    %58 = arith.cmpi eq, %0, %57 : vector<1x128xi32>
    %59 = arith.extui %58 : vector<1x128xi1> to vector<1x128xi32>
    %60 = arith.sitofp %59 : vector<1x128xi32> to vector<1x128xf32>
    %c1_16 = arith.constant 1 : index
    %c4_17 = arith.constant 4 : index
    %61 = memref.load %arg1[%c1_16, %c4_17] : memref<2x8xi32, #tpu.memory_space<smem>>
    %62 = vector.broadcast %61 : i32 to vector<1x128xi32>
    %63 = arith.cmpi eq, %0, %62 : vector<1x128xi32>
    %64 = arith.extui %63 : vector<1x128xi1> to vector<1x128xi32>
    %65 = arith.sitofp %64 : vector<1x128xi32> to vector<1x128xf32>
    %c1_18 = arith.constant 1 : index
    %c5_19 = arith.constant 5 : index
    %66 = memref.load %arg1[%c1_18, %c5_19] : memref<2x8xi32, #tpu.memory_space<smem>>
    %67 = vector.broadcast %66 : i32 to vector<1x128xi32>
    %68 = arith.cmpi eq, %0, %67 : vector<1x128xi32>
    %69 = arith.extui %68 : vector<1x128xi1> to vector<1x128xi32>
    %70 = arith.sitofp %69 : vector<1x128xi32> to vector<1x128xf32>
    %c1_20 = arith.constant 1 : index
    %c6_21 = arith.constant 6 : index
    %71 = memref.load %arg1[%c1_20, %c6_21] : memref<2x8xi32, #tpu.memory_space<smem>>
    %72 = vector.broadcast %71 : i32 to vector<1x128xi32>
    %73 = arith.cmpi eq, %0, %72 : vector<1x128xi32>
    %74 = arith.extui %73 : vector<1x128xi1> to vector<1x128xi32>
    %75 = arith.sitofp %74 : vector<1x128xi32> to vector<1x128xf32>
    %c1_22 = arith.constant 1 : index
    %c7_23 = arith.constant 7 : index
    %76 = memref.load %arg1[%c1_22, %c7_23] : memref<2x8xi32, #tpu.memory_space<smem>>
    %77 = vector.broadcast %76 : i32 to vector<1x128xi32>
    %78 = arith.cmpi eq, %0, %77 : vector<1x128xi32>
    %79 = arith.extui %78 : vector<1x128xi1> to vector<1x128xi32>
    %80 = arith.sitofp %79 : vector<1x128xi32> to vector<1x128xf32>
    %81 = tpu.concatenate %5, %10, %15, %20, %25, %30, %35, %40, %45, %50, %55, %60, %65, %70, %75, %80 in 0 : vector<1x128xf32>, vector<1x128xf32>, vector<1x128xf32>, vector<1x128xf32>, vector<1x128xf32>, vector<1x128xf32>, vector<1x128xf32>, vector<1x128xf32>, vector<1x128xf32>, vector<1x128xf32>, vector<1x128xf32>, vector<1x128xf32>, vector<1x128xf32>, vector<1x128xf32>, vector<1x128xf32>, vector<1x128xf32> -> vector<16x128xf32>
    %c0_24 = arith.constant 0 : index
    %c0_25 = arith.constant 0 : index
    %82 = vector.load %arg2[%c0_24, %c0_25] : memref<128x32xf32, #tpu.memory_space<vmem>>, vector<128x32xf32>
    %cst = arith.constant dense<0.000000e+00> : vector<16x32xf32>
    %83 = tpu.matmul %81, %82, %cst {dimension_numbers = #tpu.dot_dimension_numbers<[1], [0], [0], [1], [0, 0, 1, 1], [], []>} : vector<16x128xf32>, vector<128x32xf32>, vector<16x32xf32> -> vector<16x32xf32>
    %c0_26 = arith.constant 0 : index
    %c0_27 = arith.constant 0 : index
    %84 = vector.load %arg3[%c0_26, %c0_27] : memref<8x32xf32, #tpu.memory_space<vmem>>, vector<8x32xf32>
    %85 = tpu.concatenate %84, %84 in 0 : vector<8x32xf32>, vector<8x32xf32> -> vector<16x32xf32>
    %86 = arith.addf %83, %85 : vector<16x32xf32>
    %c0_28 = arith.constant 0 : index
    %c0_29 = arith.constant 0 : index
    %87 = vector.load %arg5[%c0_28, %c0_29] : memref<18x128xf32, #tpu.memory_space<vmem>>, vector<1x32xf32>
    %c1_30 = arith.constant 1 : index
    %c0_31 = arith.constant 0 : index
    %88 = vector.load %arg5[%c1_30, %c0_31] : memref<18x128xf32, #tpu.memory_space<vmem>>, vector<1x32xf32>
    %cst_32 = arith.constant dense<0.000000e+00> : vector<16xf32>
    %89 = vector.multi_reduction <add>, %86, %cst_32 [1] : vector<16x32xf32> to vector<16xf32>
    %90 = vector.shape_cast %89 : vector<16xf32> to vector<16x1xf32>
    %cst_33 = arith.constant 3.200000e+01 : f32
    %91 = vector.broadcast %cst_33 : f32 to vector<16x1xf32>
    %92 = arith.divf %90, %91 : vector<16x1xf32>
    %93 = vector.broadcast %92 : vector<16x1xf32> to vector<16x32xf32>
    %94 = arith.subf %86, %93 : vector<16x32xf32>
    %95 = arith.mulf %94, %94 : vector<16x32xf32>
    %cst_34 = arith.constant dense<0.000000e+00> : vector<16xf32>
    %96 = vector.multi_reduction <add>, %95, %cst_34 [1] : vector<16x32xf32> to vector<16xf32>
    %97 = vector.shape_cast %96 : vector<16xf32> to vector<16x1xf32>
    %cst_35 = arith.constant 3.200000e+01 : f32
    %98 = vector.broadcast %cst_35 : f32 to vector<16x1xf32>
    %99 = arith.divf %97, %98 : vector<16x1xf32>
    %cst_36 = arith.constant 9.99999974E-6 : f32
    %100 = vector.broadcast %cst_36 : f32 to vector<16x1xf32>
    %101 = arith.addf %99, %100 : vector<16x1xf32>
    %102 = math.rsqrt %101 : vector<16x1xf32>
    %103 = vector.broadcast %102 : vector<16x1xf32> to vector<16x32xf32>
    %104 = arith.mulf %94, %103 : vector<16x32xf32>
    %105 = vector.broadcast %87 : vector<1x32xf32> to vector<16x32xf32>
    %106 = arith.mulf %104, %105 : vector<16x32xf32>
    %107 = vector.broadcast %88 : vector<1x32xf32> to vector<16x32xf32>
    %108 = arith.addf %106, %107 : vector<16x32xf32>
    %c0_37 = arith.constant 0 : index
    %c0_38 = arith.constant 0 : index
    %c0_39 = arith.constant 0 : index
    %109 = vector.load %arg4[%c0_37, %c0_38, %c0_39] : memref<2x32x256xf32, #tpu.memory_space<vmem>>, vector<1x32x256xf32>
    %110 = vector.shape_cast %109 : vector<1x32x256xf32> to vector<32x256xf32>
    %111 = vector.extract_strided_slice %110 {offsets = [0, 0], sizes = [32, 96], strides = [1, 1]} : vector<32x256xf32> to vector<32x96xf32>
    %cst_40 = arith.constant dense<0.000000e+00> : vector<16x96xf32>
    %112 = tpu.matmul %108, %111, %cst_40 {dimension_numbers = #tpu.dot_dimension_numbers<[1], [0], [0], [1], [0, 0, 1, 1], [], []>} : vector<16x32xf32>, vector<32x96xf32>, vector<16x96xf32> -> vector<16x96xf32>
    %c2_41 = arith.constant 2 : index
    %c0_42 = arith.constant 0 : index
    %113 = vector.load %arg5[%c2_41, %c0_42] : memref<18x128xf32, #tpu.memory_space<vmem>>, vector<1x96xf32>
    %114 = vector.broadcast %113 : vector<1x96xf32> to vector<16x96xf32>
    %115 = arith.addf %112, %114 : vector<16x96xf32>
    %116 = vector.extract_strided_slice %115 {offsets = [0, 0], sizes = [8, 8], strides = [1, 1]} : vector<16x96xf32> to vector<8x8xf32>
    %117 = vector.extract_strided_slice %115 {offsets = [0, 32], sizes = [8, 8], strides = [1, 1]} : vector<16x96xf32> to vector<8x8xf32>
    %cst_43 = arith.constant dense<0.000000e+00> : vector<8x8xf32>
    %118 = tpu.matmul %116, %117, %cst_43 {dimension_numbers = #tpu.dot_dimension_numbers<[1], [1], [0], [0], [0, 0, 1, 0], [], []>} : vector<8x8xf32>, vector<8x8xf32>, vector<8x8xf32> -> vector<8x8xf32>
    %cst_44 = arith.constant 0.353553385 : f32
    %119 = vector.broadcast %cst_44 : f32 to vector<8x8xf32>
    %120 = arith.mulf %118, %119 : vector<8x8xf32>
    %121 = vector.extract_strided_slice %115 {offsets = [0, 8], sizes = [8, 8], strides = [1, 1]} : vector<16x96xf32> to vector<8x8xf32>
    %122 = vector.extract_strided_slice %115 {offsets = [0, 40], sizes = [8, 8], strides = [1, 1]} : vector<16x96xf32> to vector<8x8xf32>
    %cst_45 = arith.constant dense<0.000000e+00> : vector<8x8xf32>
    %123 = tpu.matmul %121, %122, %cst_45 {dimension_numbers = #tpu.dot_dimension_numbers<[1], [1], [0], [0], [0, 0, 1, 0], [], []>} : vector<8x8xf32>, vector<8x8xf32>, vector<8x8xf32> -> vector<8x8xf32>
    %cst_46 = arith.constant 0.353553385 : f32
    %124 = vector.broadcast %cst_46 : f32 to vector<8x8xf32>
    %125 = arith.mulf %123, %124 : vector<8x8xf32>
    %126 = vector.extract_strided_slice %115 {offsets = [0, 16], sizes = [8, 8], strides = [1, 1]} : vector<16x96xf32> to vector<8x8xf32>
    %127 = vector.extract_strided_slice %115 {offsets = [0, 48], sizes = [8, 8], strides = [1, 1]} : vector<16x96xf32> to vector<8x8xf32>
    %cst_47 = arith.constant dense<0.000000e+00> : vector<8x8xf32>
    %128 = tpu.matmul %126, %127, %cst_47 {dimension_numbers = #tpu.dot_dimension_numbers<[1], [1], [0], [0], [0, 0, 1, 0], [], []>} : vector<8x8xf32>, vector<8x8xf32>, vector<8x8xf32> -> vector<8x8xf32>
    %cst_48 = arith.constant 0.353553385 : f32
    %129 = vector.broadcast %cst_48 : f32 to vector<8x8xf32>
    %130 = arith.mulf %128, %129 : vector<8x8xf32>
    %131 = vector.extract_strided_slice %115 {offsets = [0, 24], sizes = [8, 8], strides = [1, 1]} : vector<16x96xf32> to vector<8x8xf32>
    %132 = vector.extract_strided_slice %115 {offsets = [0, 56], sizes = [8, 8], strides = [1, 1]} : vector<16x96xf32> to vector<8x8xf32>
    %cst_49 = arith.constant dense<0.000000e+00> : vector<8x8xf32>
    %133 = tpu.matmul %131, %132, %cst_49 {dimension_numbers = #tpu.dot_dimension_numbers<[1], [1], [0], [0], [0, 0, 1, 0], [], []>} : vector<8x8xf32>, vector<8x8xf32>, vector<8x8xf32> -> vector<8x8xf32>
    %cst_50 = arith.constant 0.353553385 : f32
    %134 = vector.broadcast %cst_50 : f32 to vector<8x8xf32>
    %135 = arith.mulf %133, %134 : vector<8x8xf32>
    %136 = vector.extract_strided_slice %115 {offsets = [8, 0], sizes = [8, 8], strides = [1, 1]} : vector<16x96xf32> to vector<8x8xf32>
    %137 = vector.extract_strided_slice %115 {offsets = [8, 32], sizes = [8, 8], strides = [1, 1]} : vector<16x96xf32> to vector<8x8xf32>
    %cst_51 = arith.constant dense<0.000000e+00> : vector<8x8xf32>
    %138 = tpu.matmul %136, %137, %cst_51 {dimension_numbers = #tpu.dot_dimension_numbers<[1], [1], [0], [0], [0, 0, 1, 0], [], []>} : vector<8x8xf32>, vector<8x8xf32>, vector<8x8xf32> -> vector<8x8xf32>
    %cst_52 = arith.constant 0.353553385 : f32
    %139 = vector.broadcast %cst_52 : f32 to vector<8x8xf32>
    %140 = arith.mulf %138, %139 : vector<8x8xf32>
    %141 = vector.extract_strided_slice %115 {offsets = [8, 8], sizes = [8, 8], strides = [1, 1]} : vector<16x96xf32> to vector<8x8xf32>
    %142 = vector.extract_strided_slice %115 {offsets = [8, 40], sizes = [8, 8], strides = [1, 1]} : vector<16x96xf32> to vector<8x8xf32>
    %cst_53 = arith.constant dense<0.000000e+00> : vector<8x8xf32>
    %143 = tpu.matmul %141, %142, %cst_53 {dimension_numbers = #tpu.dot_dimension_numbers<[1], [1], [0], [0], [0, 0, 1, 0], [], []>} : vector<8x8xf32>, vector<8x8xf32>, vector<8x8xf32> -> vector<8x8xf32>
    %cst_54 = arith.constant 0.353553385 : f32
    %144 = vector.broadcast %cst_54 : f32 to vector<8x8xf32>
    %145 = arith.mulf %143, %144 : vector<8x8xf32>
    %146 = vector.extract_strided_slice %115 {offsets = [8, 16], sizes = [8, 8], strides = [1, 1]} : vector<16x96xf32> to vector<8x8xf32>
    %147 = vector.extract_strided_slice %115 {offsets = [8, 48], sizes = [8, 8], strides = [1, 1]} : vector<16x96xf32> to vector<8x8xf32>
    %cst_55 = arith.constant dense<0.000000e+00> : vector<8x8xf32>
    %148 = tpu.matmul %146, %147, %cst_55 {dimension_numbers = #tpu.dot_dimension_numbers<[1], [1], [0], [0], [0, 0, 1, 0], [], []>} : vector<8x8xf32>, vector<8x8xf32>, vector<8x8xf32> -> vector<8x8xf32>
    %cst_56 = arith.constant 0.353553385 : f32
    %149 = vector.broadcast %cst_56 : f32 to vector<8x8xf32>
    %150 = arith.mulf %148, %149 : vector<8x8xf32>
    %151 = vector.extract_strided_slice %115 {offsets = [8, 24], sizes = [8, 8], strides = [1, 1]} : vector<16x96xf32> to vector<8x8xf32>
    %152 = vector.extract_strided_slice %115 {offsets = [8, 56], sizes = [8, 8], strides = [1, 1]} : vector<16x96xf32> to vector<8x8xf32>
    %cst_57 = arith.constant dense<0.000000e+00> : vector<8x8xf32>
    %153 = tpu.matmul %151, %152, %cst_57 {dimension_numbers = #tpu.dot_dimension_numbers<[1], [1], [0], [0], [0, 0, 1, 0], [], []>} : vector<8x8xf32>, vector<8x8xf32>, vector<8x8xf32> -> vector<8x8xf32>
    %cst_58 = arith.constant 0.353553385 : f32
    %154 = vector.broadcast %cst_58 : f32 to vector<8x8xf32>
    %155 = arith.mulf %153, %154 : vector<8x8xf32>
    %156 = tpu.concatenate %120, %125, %130, %135, %140, %145, %150, %155 in 0 : vector<8x8xf32>, vector<8x8xf32>, vector<8x8xf32>, vector<8x8xf32>, vector<8x8xf32>, vector<8x8xf32>, vector<8x8xf32>, vector<8x8xf32> -> vector<64x8xf32>
    %cst_59 = arith.constant dense<0xFF800000> : vector<64xf32>
    %157 = vector.multi_reduction <maximumf>, %156, %cst_59 [1] : vector<64x8xf32> to vector<64xf32>
    %158 = vector.shape_cast %157 : vector<64xf32> to vector<64x1xf32>
    %159 = vector.broadcast %158 : vector<64x1xf32> to vector<64x8xf32>
    %160 = arith.subf %156, %159 : vector<64x8xf32>
    %161 = math.exp %160 : vector<64x8xf32>
    %cst_60 = arith.constant dense<0.000000e+00> : vector<64xf32>
    %162 = vector.multi_reduction <add>, %161, %cst_60 [1] : vector<64x8xf32> to vector<64xf32>
    %163 = vector.shape_cast %162 : vector<64xf32> to vector<64x1xf32>
    %164 = vector.broadcast %163 : vector<64x1xf32> to vector<64x8xf32>
    %165 = arith.divf %161, %164 : vector<64x8xf32>
    %166 = vector.extract_strided_slice %115 {offsets = [0, 64], sizes = [8, 8], strides = [1, 1]} : vector<16x96xf32> to vector<8x8xf32>
    %167 = vector.extract_strided_slice %165 {offsets = [0, 0], sizes = [8, 8], strides = [1, 1]} : vector<64x8xf32> to vector<8x8xf32>
    %cst_61 = arith.constant dense<0.000000e+00> : vector<8x8xf32>
    %168 = tpu.matmul %167, %166, %cst_61 {dimension_numbers = #tpu.dot_dimension_numbers<[1], [0], [0], [1], [0, 0, 1, 1], [], []>} : vector<8x8xf32>, vector<8x8xf32>, vector<8x8xf32> -> vector<8x8xf32>
    %c0_62 = arith.constant 0 : index
    %c0_63 = arith.constant 0 : index
    %169 = vector.load %arg7[%c0_62, %c0_63] : memref<16x32xf32, #tpu.memory_space<vmem>>, vector<8x8xf32>
    tpu.vector_store %arg7[%c0_62, %c0_63], %168 {strides = array<i32>} : memref<16x32xf32, #tpu.memory_space<vmem>>, vector<8x8xf32>,
    %170 = vector.extract_strided_slice %115 {offsets = [0, 72], sizes = [8, 8], strides = [1, 1]} : vector<16x96xf32> to vector<8x8xf32>
    %171 = vector.extract_strided_slice %165 {offsets = [8, 0], sizes = [8, 8], strides = [1, 1]} : vector<64x8xf32> to vector<8x8xf32>
    %cst_64 = arith.constant dense<0.000000e+00> : vector<8x8xf32>
    %172 = tpu.matmul %171, %170, %cst_64 {dimension_numbers = #tpu.dot_dimension_numbers<[1], [0], [0], [1], [0, 0, 1, 1], [], []>} : vector<8x8xf32>, vector<8x8xf32>, vector<8x8xf32> -> vector<8x8xf32>
    %c0_65 = arith.constant 0 : index
    %c8 = arith.constant 8 : index
    %173 = vector.load %arg7[%c0_65, %c8] : memref<16x32xf32, #tpu.memory_space<vmem>>, vector<8x8xf32>
    tpu.vector_store %arg7[%c0_65, %c8], %172 {strides = array<i32>} : memref<16x32xf32, #tpu.memory_space<vmem>>, vector<8x8xf32>,
    %174 = vector.extract_strided_slice %115 {offsets = [0, 80], sizes = [8, 8], strides = [1, 1]} : vector<16x96xf32> to vector<8x8xf32>
    %175 = vector.extract_strided_slice %165 {offsets = [16, 0], sizes = [8, 8], strides = [1, 1]} : vector<64x8xf32> to vector<8x8xf32>
    %cst_66 = arith.constant dense<0.000000e+00> : vector<8x8xf32>
    %176 = tpu.matmul %175, %174, %cst_66 {dimension_numbers = #tpu.dot_dimension_numbers<[1], [0], [0], [1], [0, 0, 1, 1], [], []>} : vector<8x8xf32>, vector<8x8xf32>, vector<8x8xf32> -> vector<8x8xf32>
    %c0_67 = arith.constant 0 : index
    %c16 = arith.constant 16 : index
    %177 = vector.load %arg7[%c0_67, %c16] : memref<16x32xf32, #tpu.memory_space<vmem>>, vector<8x8xf32>
    tpu.vector_store %arg7[%c0_67, %c16], %176 {strides = array<i32>} : memref<16x32xf32, #tpu.memory_space<vmem>>, vector<8x8xf32>,
    %178 = vector.extract_strided_slice %115 {offsets = [0, 88], sizes = [8, 8], strides = [1, 1]} : vector<16x96xf32> to vector<8x8xf32>
    %179 = vector.extract_strided_slice %165 {offsets = [24, 0], sizes = [8, 8], strides = [1, 1]} : vector<64x8xf32> to vector<8x8xf32>
    %cst_68 = arith.constant dense<0.000000e+00> : vector<8x8xf32>
    %180 = tpu.matmul %179, %178, %cst_68 {dimension_numbers = #tpu.dot_dimension_numbers<[1], [0], [0], [1], [0, 0, 1, 1], [], []>} : vector<8x8xf32>, vector<8x8xf32>, vector<8x8xf32> -> vector<8x8xf32>
    %c0_69 = arith.constant 0 : index
    %c24 = arith.constant 24 : index
    %181 = vector.load %arg7[%c0_69, %c24] : memref<16x32xf32, #tpu.memory_space<vmem>>, vector<8x8xf32>
    tpu.vector_store %arg7[%c0_69, %c24], %180 {strides = array<i32>} : memref<16x32xf32, #tpu.memory_space<vmem>>, vector<8x8xf32>,
    %182 = vector.extract_strided_slice %115 {offsets = [8, 64], sizes = [8, 8], strides = [1, 1]} : vector<16x96xf32> to vector<8x8xf32>
    %183 = vector.extract_strided_slice %165 {offsets = [32, 0], sizes = [8, 8], strides = [1, 1]} : vector<64x8xf32> to vector<8x8xf32>
    %cst_70 = arith.constant dense<0.000000e+00> : vector<8x8xf32>
    %184 = tpu.matmul %183, %182, %cst_70 {dimension_numbers = #tpu.dot_dimension_numbers<[1], [0], [0], [1], [0, 0, 1, 1], [], []>} : vector<8x8xf32>, vector<8x8xf32>, vector<8x8xf32> -> vector<8x8xf32>
    %c8_71 = arith.constant 8 : index
    %c0_72 = arith.constant 0 : index
    %185 = vector.load %arg7[%c8_71, %c0_72] : memref<16x32xf32, #tpu.memory_space<vmem>>, vector<8x8xf32>
    tpu.vector_store %arg7[%c8_71, %c0_72], %184 {strides = array<i32>} : memref<16x32xf32, #tpu.memory_space<vmem>>, vector<8x8xf32>,
    %186 = vector.extract_strided_slice %115 {offsets = [8, 72], sizes = [8, 8], strides = [1, 1]} : vector<16x96xf32> to vector<8x8xf32>
    %187 = vector.extract_strided_slice %165 {offsets = [40, 0], sizes = [8, 8], strides = [1, 1]} : vector<64x8xf32> to vector<8x8xf32>
    %cst_73 = arith.constant dense<0.000000e+00> : vector<8x8xf32>
    %188 = tpu.matmul %187, %186, %cst_73 {dimension_numbers = #tpu.dot_dimension_numbers<[1], [0], [0], [1], [0, 0, 1, 1], [], []>} : vector<8x8xf32>, vector<8x8xf32>, vector<8x8xf32> -> vector<8x8xf32>
    %c8_74 = arith.constant 8 : index
    %c8_75 = arith.constant 8 : index
    %189 = vector.load %arg7[%c8_74, %c8_75] : memref<16x32xf32, #tpu.memory_space<vmem>>, vector<8x8xf32>
    tpu.vector_store %arg7[%c8_74, %c8_75], %188 {strides = array<i32>} : memref<16x32xf32, #tpu.memory_space<vmem>>, vector<8x8xf32>,
    %190 = vector.extract_strided_slice %115 {offsets = [8, 80], sizes = [8, 8], strides = [1, 1]} : vector<16x96xf32> to vector<8x8xf32>
    %191 = vector.extract_strided_slice %165 {offsets = [48, 0], sizes = [8, 8], strides = [1, 1]} : vector<64x8xf32> to vector<8x8xf32>
    %cst_76 = arith.constant dense<0.000000e+00> : vector<8x8xf32>
    %192 = tpu.matmul %191, %190, %cst_76 {dimension_numbers = #tpu.dot_dimension_numbers<[1], [0], [0], [1], [0, 0, 1, 1], [], []>} : vector<8x8xf32>, vector<8x8xf32>, vector<8x8xf32> -> vector<8x8xf32>
    %c8_77 = arith.constant 8 : index
    %c16_78 = arith.constant 16 : index
    %193 = vector.load %arg7[%c8_77, %c16_78] : memref<16x32xf32, #tpu.memory_space<vmem>>, vector<8x8xf32>
    tpu.vector_store %arg7[%c8_77, %c16_78], %192 {strides = array<i32>} : memref<16x32xf32, #tpu.memory_space<vmem>>, vector<8x8xf32>,
    %194 = vector.extract_strided_slice %115 {offsets = [8, 88], sizes = [8, 8], strides = [1, 1]} : vector<16x96xf32> to vector<8x8xf32>
    %195 = vector.extract_strided_slice %165 {offsets = [56, 0], sizes = [8, 8], strides = [1, 1]} : vector<64x8xf32> to vector<8x8xf32>
    %cst_79 = arith.constant dense<0.000000e+00> : vector<8x8xf32>
    %196 = tpu.matmul %195, %194, %cst_79 {dimension_numbers = #tpu.dot_dimension_numbers<[1], [0], [0], [1], [0, 0, 1, 1], [], []>} : vector<8x8xf32>, vector<8x8xf32>, vector<8x8xf32> -> vector<8x8xf32>
    %c8_80 = arith.constant 8 : index
    %c24_81 = arith.constant 24 : index
    %197 = vector.load %arg7[%c8_80, %c24_81] : memref<16x32xf32, #tpu.memory_space<vmem>>, vector<8x8xf32>
    tpu.vector_store %arg7[%c8_80, %c24_81], %196 {strides = array<i32>} : memref<16x32xf32, #tpu.memory_space<vmem>>, vector<8x8xf32>,
    %c0_82 = arith.constant 0 : index
    %c0_83 = arith.constant 0 : index
    %198 = vector.load %arg7[%c0_82, %c0_83] : memref<16x32xf32, #tpu.memory_space<vmem>>, vector<16x32xf32>
    %199 = vector.extract_strided_slice %110 {offsets = [0, 96], sizes = [32, 32], strides = [1, 1]} : vector<32x256xf32> to vector<32x32xf32>
    %cst_84 = arith.constant dense<0.000000e+00> : vector<16x32xf32>
    %200 = tpu.matmul %198, %199, %cst_84 {dimension_numbers = #tpu.dot_dimension_numbers<[1], [0], [0], [1], [0, 0, 1, 1], [], []>} : vector<16x32xf32>, vector<32x32xf32>, vector<16x32xf32> -> vector<16x32xf32>
    %c3_85 = arith.constant 3 : index
    %c0_86 = arith.constant 0 : index
    %201 = vector.load %arg5[%c3_85, %c0_86] : memref<18x128xf32, #tpu.memory_space<vmem>>, vector<1x32xf32>
    %202 = vector.broadcast %201 : vector<1x32xf32> to vector<16x32xf32>
    %203 = arith.addf %200, %202 : vector<16x32xf32>
    %204 = arith.addf %203, %108 : vector<16x32xf32>
    %c4_87 = arith.constant 4 : index
    %c0_88 = arith.constant 0 : index
    %205 = vector.load %arg5[%c4_87, %c0_88] : memref<18x128xf32, #tpu.memory_space<vmem>>, vector<1x32xf32>
    %c5_89 = arith.constant 5 : index
    %c0_90 = arith.constant 0 : index
    %206 = vector.load %arg5[%c5_89, %c0_90] : memref<18x128xf32, #tpu.memory_space<vmem>>, vector<1x32xf32>
    %cst_91 = arith.constant dense<0.000000e+00> : vector<16xf32>
    %207 = vector.multi_reduction <add>, %204, %cst_91 [1] : vector<16x32xf32> to vector<16xf32>
    %208 = vector.shape_cast %207 : vector<16xf32> to vector<16x1xf32>
    %cst_92 = arith.constant 3.200000e+01 : f32
    %209 = vector.broadcast %cst_92 : f32 to vector<16x1xf32>
    %210 = arith.divf %208, %209 : vector<16x1xf32>
    %211 = vector.broadcast %210 : vector<16x1xf32> to vector<16x32xf32>
    %212 = arith.subf %204, %211 : vector<16x32xf32>
    %213 = arith.mulf %212, %212 : vector<16x32xf32>
    %cst_93 = arith.constant dense<0.000000e+00> : vector<16xf32>
    %214 = vector.multi_reduction <add>, %213, %cst_93 [1] : vector<16x32xf32> to vector<16xf32>
    %215 = vector.shape_cast %214 : vector<16xf32> to vector<16x1xf32>
    %cst_94 = arith.constant 3.200000e+01 : f32
    %216 = vector.broadcast %cst_94 : f32 to vector<16x1xf32>
    %217 = arith.divf %215, %216 : vector<16x1xf32>
    %cst_95 = arith.constant 9.99999974E-6 : f32
    %218 = vector.broadcast %cst_95 : f32 to vector<16x1xf32>
    %219 = arith.addf %217, %218 : vector<16x1xf32>
    %220 = math.rsqrt %219 : vector<16x1xf32>
    %221 = vector.broadcast %220 : vector<16x1xf32> to vector<16x32xf32>
    %222 = arith.mulf %212, %221 : vector<16x32xf32>
    %223 = vector.broadcast %205 : vector<1x32xf32> to vector<16x32xf32>
    %224 = arith.mulf %222, %223 : vector<16x32xf32>
    %225 = vector.broadcast %206 : vector<1x32xf32> to vector<16x32xf32>
    %226 = arith.addf %224, %225 : vector<16x32xf32>
    %227 = vector.extract_strided_slice %110 {offsets = [0, 128], sizes = [32, 64], strides = [1, 1]} : vector<32x256xf32> to vector<32x64xf32>
    %cst_96 = arith.constant dense<0.000000e+00> : vector<16x64xf32>
    %228 = tpu.matmul %226, %227, %cst_96 {dimension_numbers = #tpu.dot_dimension_numbers<[1], [0], [0], [1], [0, 0, 1, 1], [], []>} : vector<16x32xf32>, vector<32x64xf32>, vector<16x64xf32> -> vector<16x64xf32>
    %c6_97 = arith.constant 6 : index
    %c0_98 = arith.constant 0 : index
    %229 = vector.load %arg5[%c6_97, %c0_98] : memref<18x128xf32, #tpu.memory_space<vmem>>, vector<1x64xf32>
    %230 = vector.broadcast %229 : vector<1x64xf32> to vector<16x64xf32>
    %231 = arith.addf %228, %230 : vector<16x64xf32>
    %cst_99 = arith.constant 5.000000e-01 : f32
    %232 = vector.broadcast %cst_99 : f32 to vector<16x64xf32>
    %233 = arith.mulf %232, %231 : vector<16x64xf32>
    %cst_100 = arith.constant 0.707106769 : f32
    %234 = vector.broadcast %cst_100 : f32 to vector<16x64xf32>
    %235 = arith.mulf %231, %234 : vector<16x64xf32>
    %236 = math.erf %235 : vector<16x64xf32>
    %cst_101 = arith.constant 1.000000e+00 : f32
    %237 = vector.broadcast %cst_101 : f32 to vector<16x64xf32>
    %238 = arith.addf %237, %236 : vector<16x64xf32>
    %239 = arith.mulf %233, %238 : vector<16x64xf32>
    %240 = vector.extract_strided_slice %110 {offsets = [0, 192], sizes = [32, 64], strides = [1, 1]} : vector<32x256xf32> to vector<32x64xf32>
    %cst_102 = arith.constant dense<0.000000e+00> : vector<16x32xf32>
    %241 = tpu.matmul %239, %240, %cst_102 {dimension_numbers = #tpu.dot_dimension_numbers<[1], [1], [0], [0], [0, 0, 1, 0], [], []>} : vector<16x64xf32>, vector<32x64xf32>, vector<16x32xf32> -> vector<16x32xf32>
    %c7_103 = arith.constant 7 : index
    %c0_104 = arith.constant 0 : index
    %242 = vector.load %arg5[%c7_103, %c0_104] : memref<18x128xf32, #tpu.memory_space<vmem>>, vector<1x32xf32>
    %243 = vector.broadcast %242 : vector<1x32xf32> to vector<16x32xf32>
    %244 = arith.addf %241, %243 : vector<16x32xf32>
    %245 = arith.addf %244, %226 : vector<16x32xf32>
    %c8_105 = arith.constant 8 : index
    %c0_106 = arith.constant 0 : index
    %246 = vector.load %arg5[%c8_105, %c0_106] : memref<18x128xf32, #tpu.memory_space<vmem>>, vector<1x32xf32>
    %c9 = arith.constant 9 : index
    %c0_107 = arith.constant 0 : index
    %247 = vector.load %arg5[%c9, %c0_107] : memref<18x128xf32, #tpu.memory_space<vmem>>, vector<1x32xf32>
    %cst_108 = arith.constant dense<0.000000e+00> : vector<16xf32>
    %248 = vector.multi_reduction <add>, %245, %cst_108 [1] : vector<16x32xf32> to vector<16xf32>
    %249 = vector.shape_cast %248 : vector<16xf32> to vector<16x1xf32>
    %cst_109 = arith.constant 3.200000e+01 : f32
    %250 = vector.broadcast %cst_109 : f32 to vector<16x1xf32>
    %251 = arith.divf %249, %250 : vector<16x1xf32>
    %252 = vector.broadcast %251 : vector<16x1xf32> to vector<16x32xf32>
    %253 = arith.subf %245, %252 : vector<16x32xf32>
    %254 = arith.mulf %253, %253 : vector<16x32xf32>
    %cst_110 = arith.constant dense<0.000000e+00> : vector<16xf32>
    %255 = vector.multi_reduction <add>, %254, %cst_110 [1] : vector<16x32xf32> to vector<16xf32>
    %256 = vector.shape_cast %255 : vector<16xf32> to vector<16x1xf32>
    %cst_111 = arith.constant 3.200000e+01 : f32
    %257 = vector.broadcast %cst_111 : f32 to vector<16x1xf32>
    %258 = arith.divf %256, %257 : vector<16x1xf32>
    %cst_112 = arith.constant 9.99999974E-6 : f32
    %259 = vector.broadcast %cst_112 : f32 to vector<16x1xf32>
    %260 = arith.addf %258, %259 : vector<16x1xf32>
    %261 = math.rsqrt %260 : vector<16x1xf32>
    %262 = vector.broadcast %261 : vector<16x1xf32> to vector<16x32xf32>
    %263 = arith.mulf %253, %262 : vector<16x32xf32>
    %264 = vector.broadcast %246 : vector<1x32xf32> to vector<16x32xf32>
    %265 = arith.mulf %263, %264 : vector<16x32xf32>
    %266 = vector.broadcast %247 : vector<1x32xf32> to vector<16x32xf32>
    %267 = arith.addf %265, %266 : vector<16x32xf32>
    %c1_113 = arith.constant 1 : index
    %c0_114 = arith.constant 0 : index
    %c0_115 = arith.constant 0 : index
    %268 = vector.load %arg4[%c1_113, %c0_114, %c0_115] : memref<2x32x256xf32, #tpu.memory_space<vmem>>, vector<1x32x256xf32>
    %269 = vector.shape_cast %268 : vector<1x32x256xf32> to vector<32x256xf32>
    %270 = vector.extract_strided_slice %269 {offsets = [0, 0], sizes = [32, 96], strides = [1, 1]} : vector<32x256xf32> to vector<32x96xf32>
    %cst_116 = arith.constant dense<0.000000e+00> : vector<16x96xf32>
    %271 = tpu.matmul %267, %270, %cst_116 {dimension_numbers = #tpu.dot_dimension_numbers<[1], [0], [0], [1], [0, 0, 1, 1], [], []>} : vector<16x32xf32>, vector<32x96xf32>, vector<16x96xf32> -> vector<16x96xf32>
    %c10 = arith.constant 10 : index
    %c0_117 = arith.constant 0 : index
    %272 = vector.load %arg5[%c10, %c0_117] : memref<18x128xf32, #tpu.memory_space<vmem>>, vector<1x96xf32>
    %273 = vector.broadcast %272 : vector<1x96xf32> to vector<16x96xf32>
    %274 = arith.addf %271, %273 : vector<16x96xf32>
    %275 = vector.extract_strided_slice %274 {offsets = [0, 0], sizes = [8, 8], strides = [1, 1]} : vector<16x96xf32> to vector<8x8xf32>
    %276 = vector.extract_strided_slice %274 {offsets = [0, 32], sizes = [8, 8], strides = [1, 1]} : vector<16x96xf32> to vector<8x8xf32>
    %cst_118 = arith.constant dense<0.000000e+00> : vector<8x8xf32>
    %277 = tpu.matmul %275, %276, %cst_118 {dimension_numbers = #tpu.dot_dimension_numbers<[1], [1], [0], [0], [0, 0, 1, 0], [], []>} : vector<8x8xf32>, vector<8x8xf32>, vector<8x8xf32> -> vector<8x8xf32>
    %cst_119 = arith.constant 0.353553385 : f32
    %278 = vector.broadcast %cst_119 : f32 to vector<8x8xf32>
    %279 = arith.mulf %277, %278 : vector<8x8xf32>
    %280 = vector.extract_strided_slice %274 {offsets = [0, 8], sizes = [8, 8], strides = [1, 1]} : vector<16x96xf32> to vector<8x8xf32>
    %281 = vector.extract_strided_slice %274 {offsets = [0, 40], sizes = [8, 8], strides = [1, 1]} : vector<16x96xf32> to vector<8x8xf32>
    %cst_120 = arith.constant dense<0.000000e+00> : vector<8x8xf32>
    %282 = tpu.matmul %280, %281, %cst_120 {dimension_numbers = #tpu.dot_dimension_numbers<[1], [1], [0], [0], [0, 0, 1, 0], [], []>} : vector<8x8xf32>, vector<8x8xf32>, vector<8x8xf32> -> vector<8x8xf32>
    %cst_121 = arith.constant 0.353553385 : f32
    %283 = vector.broadcast %cst_121 : f32 to vector<8x8xf32>
    %284 = arith.mulf %282, %283 : vector<8x8xf32>
    %285 = vector.extract_strided_slice %274 {offsets = [0, 16], sizes = [8, 8], strides = [1, 1]} : vector<16x96xf32> to vector<8x8xf32>
    %286 = vector.extract_strided_slice %274 {offsets = [0, 48], sizes = [8, 8], strides = [1, 1]} : vector<16x96xf32> to vector<8x8xf32>
    %cst_122 = arith.constant dense<0.000000e+00> : vector<8x8xf32>
    %287 = tpu.matmul %285, %286, %cst_122 {dimension_numbers = #tpu.dot_dimension_numbers<[1], [1], [0], [0], [0, 0, 1, 0], [], []>} : vector<8x8xf32>, vector<8x8xf32>, vector<8x8xf32> -> vector<8x8xf32>
    %cst_123 = arith.constant 0.353553385 : f32
    %288 = vector.broadcast %cst_123 : f32 to vector<8x8xf32>
    %289 = arith.mulf %287, %288 : vector<8x8xf32>
    %290 = vector.extract_strided_slice %274 {offsets = [0, 24], sizes = [8, 8], strides = [1, 1]} : vector<16x96xf32> to vector<8x8xf32>
    %291 = vector.extract_strided_slice %274 {offsets = [0, 56], sizes = [8, 8], strides = [1, 1]} : vector<16x96xf32> to vector<8x8xf32>
    %cst_124 = arith.constant dense<0.000000e+00> : vector<8x8xf32>
    %292 = tpu.matmul %290, %291, %cst_124 {dimension_numbers = #tpu.dot_dimension_numbers<[1], [1], [0], [0], [0, 0, 1, 0], [], []>} : vector<8x8xf32>, vector<8x8xf32>, vector<8x8xf32> -> vector<8x8xf32>
    %cst_125 = arith.constant 0.353553385 : f32
    %293 = vector.broadcast %cst_125 : f32 to vector<8x8xf32>
    %294 = arith.mulf %292, %293 : vector<8x8xf32>
    %295 = vector.extract_strided_slice %274 {offsets = [8, 0], sizes = [8, 8], strides = [1, 1]} : vector<16x96xf32> to vector<8x8xf32>
    %296 = vector.extract_strided_slice %274 {offsets = [8, 32], sizes = [8, 8], strides = [1, 1]} : vector<16x96xf32> to vector<8x8xf32>
    %cst_126 = arith.constant dense<0.000000e+00> : vector<8x8xf32>
    %297 = tpu.matmul %295, %296, %cst_126 {dimension_numbers = #tpu.dot_dimension_numbers<[1], [1], [0], [0], [0, 0, 1, 0], [], []>} : vector<8x8xf32>, vector<8x8xf32>, vector<8x8xf32> -> vector<8x8xf32>
    %cst_127 = arith.constant 0.353553385 : f32
    %298 = vector.broadcast %cst_127 : f32 to vector<8x8xf32>
    %299 = arith.mulf %297, %298 : vector<8x8xf32>
    %300 = vector.extract_strided_slice %274 {offsets = [8, 8], sizes = [8, 8], strides = [1, 1]} : vector<16x96xf32> to vector<8x8xf32>
    %301 = vector.extract_strided_slice %274 {offsets = [8, 40], sizes = [8, 8], strides = [1, 1]} : vector<16x96xf32> to vector<8x8xf32>
    %cst_128 = arith.constant dense<0.000000e+00> : vector<8x8xf32>
    %302 = tpu.matmul %300, %301, %cst_128 {dimension_numbers = #tpu.dot_dimension_numbers<[1], [1], [0], [0], [0, 0, 1, 0], [], []>} : vector<8x8xf32>, vector<8x8xf32>, vector<8x8xf32> -> vector<8x8xf32>
    %cst_129 = arith.constant 0.353553385 : f32
    %303 = vector.broadcast %cst_129 : f32 to vector<8x8xf32>
    %304 = arith.mulf %302, %303 : vector<8x8xf32>
    %305 = vector.extract_strided_slice %274 {offsets = [8, 16], sizes = [8, 8], strides = [1, 1]} : vector<16x96xf32> to vector<8x8xf32>
    %306 = vector.extract_strided_slice %274 {offsets = [8, 48], sizes = [8, 8], strides = [1, 1]} : vector<16x96xf32> to vector<8x8xf32>
    %cst_130 = arith.constant dense<0.000000e+00> : vector<8x8xf32>
    %307 = tpu.matmul %305, %306, %cst_130 {dimension_numbers = #tpu.dot_dimension_numbers<[1], [1], [0], [0], [0, 0, 1, 0], [], []>} : vector<8x8xf32>, vector<8x8xf32>, vector<8x8xf32> -> vector<8x8xf32>
    %cst_131 = arith.constant 0.353553385 : f32
    %308 = vector.broadcast %cst_131 : f32 to vector<8x8xf32>
    %309 = arith.mulf %307, %308 : vector<8x8xf32>
    %310 = vector.extract_strided_slice %274 {offsets = [8, 24], sizes = [8, 8], strides = [1, 1]} : vector<16x96xf32> to vector<8x8xf32>
    %311 = vector.extract_strided_slice %274 {offsets = [8, 56], sizes = [8, 8], strides = [1, 1]} : vector<16x96xf32> to vector<8x8xf32>
    %cst_132 = arith.constant dense<0.000000e+00> : vector<8x8xf32>
    %312 = tpu.matmul %310, %311, %cst_132 {dimension_numbers = #tpu.dot_dimension_numbers<[1], [1], [0], [0], [0, 0, 1, 0], [], []>} : vector<8x8xf32>, vector<8x8xf32>, vector<8x8xf32> -> vector<8x8xf32>
    %cst_133 = arith.constant 0.353553385 : f32
    %313 = vector.broadcast %cst_133 : f32 to vector<8x8xf32>
    %314 = arith.mulf %312, %313 : vector<8x8xf32>
    %315 = tpu.concatenate %279, %284, %289, %294, %299, %304, %309, %314 in 0 : vector<8x8xf32>, vector<8x8xf32>, vector<8x8xf32>, vector<8x8xf32>, vector<8x8xf32>, vector<8x8xf32>, vector<8x8xf32>, vector<8x8xf32> -> vector<64x8xf32>
    %cst_134 = arith.constant dense<0xFF800000> : vector<64xf32>
    %316 = vector.multi_reduction <maximumf>, %315, %cst_134 [1] : vector<64x8xf32> to vector<64xf32>
    %317 = vector.shape_cast %316 : vector<64xf32> to vector<64x1xf32>
    %318 = vector.broadcast %317 : vector<64x1xf32> to vector<64x8xf32>
    %319 = arith.subf %315, %318 : vector<64x8xf32>
    %320 = math.exp %319 : vector<64x8xf32>
    %cst_135 = arith.constant dense<0.000000e+00> : vector<64xf32>
    %321 = vector.multi_reduction <add>, %320, %cst_135 [1] : vector<64x8xf32> to vector<64xf32>
    %322 = vector.shape_cast %321 : vector<64xf32> to vector<64x1xf32>
    %323 = vector.broadcast %322 : vector<64x1xf32> to vector<64x8xf32>
    %324 = arith.divf %320, %323 : vector<64x8xf32>
    %325 = vector.extract_strided_slice %274 {offsets = [0, 64], sizes = [8, 8], strides = [1, 1]} : vector<16x96xf32> to vector<8x8xf32>
    %326 = vector.extract_strided_slice %324 {offsets = [0, 0], sizes = [8, 8], strides = [1, 1]} : vector<64x8xf32> to vector<8x8xf32>
    %cst_136 = arith.constant dense<0.000000e+00> : vector<8x8xf32>
    %327 = tpu.matmul %326, %325, %cst_136 {dimension_numbers = #tpu.dot_dimension_numbers<[1], [0], [0], [1], [0, 0, 1, 1], [], []>} : vector<8x8xf32>, vector<8x8xf32>, vector<8x8xf32> -> vector<8x8xf32>
    %c0_137 = arith.constant 0 : index
    %c0_138 = arith.constant 0 : index
    %328 = vector.load %arg7[%c0_137, %c0_138] : memref<16x32xf32, #tpu.memory_space<vmem>>, vector<8x8xf32>
    tpu.vector_store %arg7[%c0_137, %c0_138], %327 {strides = array<i32>} : memref<16x32xf32, #tpu.memory_space<vmem>>, vector<8x8xf32>,
    %329 = vector.extract_strided_slice %274 {offsets = [0, 72], sizes = [8, 8], strides = [1, 1]} : vector<16x96xf32> to vector<8x8xf32>
    %330 = vector.extract_strided_slice %324 {offsets = [8, 0], sizes = [8, 8], strides = [1, 1]} : vector<64x8xf32> to vector<8x8xf32>
    %cst_139 = arith.constant dense<0.000000e+00> : vector<8x8xf32>
    %331 = tpu.matmul %330, %329, %cst_139 {dimension_numbers = #tpu.dot_dimension_numbers<[1], [0], [0], [1], [0, 0, 1, 1], [], []>} : vector<8x8xf32>, vector<8x8xf32>, vector<8x8xf32> -> vector<8x8xf32>
    %c0_140 = arith.constant 0 : index
    %c8_141 = arith.constant 8 : index
    %332 = vector.load %arg7[%c0_140, %c8_141] : memref<16x32xf32, #tpu.memory_space<vmem>>, vector<8x8xf32>
    tpu.vector_store %arg7[%c0_140, %c8_141], %331 {strides = array<i32>} : memref<16x32xf32, #tpu.memory_space<vmem>>, vector<8x8xf32>,
    %333 = vector.extract_strided_slice %274 {offsets = [0, 80], sizes = [8, 8], strides = [1, 1]} : vector<16x96xf32> to vector<8x8xf32>
    %334 = vector.extract_strided_slice %324 {offsets = [16, 0], sizes = [8, 8], strides = [1, 1]} : vector<64x8xf32> to vector<8x8xf32>
    %cst_142 = arith.constant dense<0.000000e+00> : vector<8x8xf32>
    %335 = tpu.matmul %334, %333, %cst_142 {dimension_numbers = #tpu.dot_dimension_numbers<[1], [0], [0], [1], [0, 0, 1, 1], [], []>} : vector<8x8xf32>, vector<8x8xf32>, vector<8x8xf32> -> vector<8x8xf32>
    %c0_143 = arith.constant 0 : index
    %c16_144 = arith.constant 16 : index
    %336 = vector.load %arg7[%c0_143, %c16_144] : memref<16x32xf32, #tpu.memory_space<vmem>>, vector<8x8xf32>
    tpu.vector_store %arg7[%c0_143, %c16_144], %335 {strides = array<i32>} : memref<16x32xf32, #tpu.memory_space<vmem>>, vector<8x8xf32>,
    %337 = vector.extract_strided_slice %274 {offsets = [0, 88], sizes = [8, 8], strides = [1, 1]} : vector<16x96xf32> to vector<8x8xf32>
    %338 = vector.extract_strided_slice %324 {offsets = [24, 0], sizes = [8, 8], strides = [1, 1]} : vector<64x8xf32> to vector<8x8xf32>
    %cst_145 = arith.constant dense<0.000000e+00> : vector<8x8xf32>
    %339 = tpu.matmul %338, %337, %cst_145 {dimension_numbers = #tpu.dot_dimension_numbers<[1], [0], [0], [1], [0, 0, 1, 1], [], []>} : vector<8x8xf32>, vector<8x8xf32>, vector<8x8xf32> -> vector<8x8xf32>
    %c0_146 = arith.constant 0 : index
    %c24_147 = arith.constant 24 : index
    %340 = vector.load %arg7[%c0_146, %c24_147] : memref<16x32xf32, #tpu.memory_space<vmem>>, vector<8x8xf32>
    tpu.vector_store %arg7[%c0_146, %c24_147], %339 {strides = array<i32>} : memref<16x32xf32, #tpu.memory_space<vmem>>, vector<8x8xf32>,
    %341 = vector.extract_strided_slice %274 {offsets = [8, 64], sizes = [8, 8], strides = [1, 1]} : vector<16x96xf32> to vector<8x8xf32>
    %342 = vector.extract_strided_slice %324 {offsets = [32, 0], sizes = [8, 8], strides = [1, 1]} : vector<64x8xf32> to vector<8x8xf32>
    %cst_148 = arith.constant dense<0.000000e+00> : vector<8x8xf32>
    %343 = tpu.matmul %342, %341, %cst_148 {dimension_numbers = #tpu.dot_dimension_numbers<[1], [0], [0], [1], [0, 0, 1, 1], [], []>} : vector<8x8xf32>, vector<8x8xf32>, vector<8x8xf32> -> vector<8x8xf32>
    %c8_149 = arith.constant 8 : index
    %c0_150 = arith.constant 0 : index
    %344 = vector.load %arg7[%c8_149, %c0_150] : memref<16x32xf32, #tpu.memory_space<vmem>>, vector<8x8xf32>
    tpu.vector_store %arg7[%c8_149, %c0_150], %343 {strides = array<i32>} : memref<16x32xf32, #tpu.memory_space<vmem>>, vector<8x8xf32>,
    %345 = vector.extract_strided_slice %274 {offsets = [8, 72], sizes = [8, 8], strides = [1, 1]} : vector<16x96xf32> to vector<8x8xf32>
    %346 = vector.extract_strided_slice %324 {offsets = [40, 0], sizes = [8, 8], strides = [1, 1]} : vector<64x8xf32> to vector<8x8xf32>
    %cst_151 = arith.constant dense<0.000000e+00> : vector<8x8xf32>
    %347 = tpu.matmul %346, %345, %cst_151 {dimension_numbers = #tpu.dot_dimension_numbers<[1], [0], [0], [1], [0, 0, 1, 1], [], []>} : vector<8x8xf32>, vector<8x8xf32>, vector<8x8xf32> -> vector<8x8xf32>
    %c8_152 = arith.constant 8 : index
    %c8_153 = arith.constant 8 : index
    %348 = vector.load %arg7[%c8_152, %c8_153] : memref<16x32xf32, #tpu.memory_space<vmem>>, vector<8x8xf32>
    tpu.vector_store %arg7[%c8_152, %c8_153], %347 {strides = array<i32>} : memref<16x32xf32, #tpu.memory_space<vmem>>, vector<8x8xf32>,
    %349 = vector.extract_strided_slice %274 {offsets = [8, 80], sizes = [8, 8], strides = [1, 1]} : vector<16x96xf32> to vector<8x8xf32>
    %350 = vector.extract_strided_slice %324 {offsets = [48, 0], sizes = [8, 8], strides = [1, 1]} : vector<64x8xf32> to vector<8x8xf32>
    %cst_154 = arith.constant dense<0.000000e+00> : vector<8x8xf32>
    %351 = tpu.matmul %350, %349, %cst_154 {dimension_numbers = #tpu.dot_dimension_numbers<[1], [0], [0], [1], [0, 0, 1, 1], [], []>} : vector<8x8xf32>, vector<8x8xf32>, vector<8x8xf32> -> vector<8x8xf32>
    %c8_155 = arith.constant 8 : index
    %c16_156 = arith.constant 16 : index
    %352 = vector.load %arg7[%c8_155, %c16_156] : memref<16x32xf32, #tpu.memory_space<vmem>>, vector<8x8xf32>
    tpu.vector_store %arg7[%c8_155, %c16_156], %351 {strides = array<i32>} : memref<16x32xf32, #tpu.memory_space<vmem>>, vector<8x8xf32>,
    %353 = vector.extract_strided_slice %274 {offsets = [8, 88], sizes = [8, 8], strides = [1, 1]} : vector<16x96xf32> to vector<8x8xf32>
    %354 = vector.extract_strided_slice %324 {offsets = [56, 0], sizes = [8, 8], strides = [1, 1]} : vector<64x8xf32> to vector<8x8xf32>
    %cst_157 = arith.constant dense<0.000000e+00> : vector<8x8xf32>
    %355 = tpu.matmul %354, %353, %cst_157 {dimension_numbers = #tpu.dot_dimension_numbers<[1], [0], [0], [1], [0, 0, 1, 1], [], []>} : vector<8x8xf32>, vector<8x8xf32>, vector<8x8xf32> -> vector<8x8xf32>
    %c8_158 = arith.constant 8 : index
    %c24_159 = arith.constant 24 : index
    %356 = vector.load %arg7[%c8_158, %c24_159] : memref<16x32xf32, #tpu.memory_space<vmem>>, vector<8x8xf32>
    tpu.vector_store %arg7[%c8_158, %c24_159], %355 {strides = array<i32>} : memref<16x32xf32, #tpu.memory_space<vmem>>, vector<8x8xf32>,
    %c0_160 = arith.constant 0 : index
    %c0_161 = arith.constant 0 : index
    %357 = vector.load %arg7[%c0_160, %c0_161] : memref<16x32xf32, #tpu.memory_space<vmem>>, vector<16x32xf32>
    %358 = vector.extract_strided_slice %269 {offsets = [0, 96], sizes = [32, 32], strides = [1, 1]} : vector<32x256xf32> to vector<32x32xf32>
    %cst_162 = arith.constant dense<0.000000e+00> : vector<16x32xf32>
    %359 = tpu.matmul %357, %358, %cst_162 {dimension_numbers = #tpu.dot_dimension_numbers<[1], [0], [0], [1], [0, 0, 1, 1], [], []>} : vector<16x32xf32>, vector<32x32xf32>, vector<16x32xf32> -> vector<16x32xf32>
    %c11 = arith.constant 11 : index
    %c0_163 = arith.constant 0 : index
    %360 = vector.load %arg5[%c11, %c0_163] : memref<18x128xf32, #tpu.memory_space<vmem>>, vector<1x32xf32>
    %361 = vector.broadcast %360 : vector<1x32xf32> to vector<16x32xf32>
    %362 = arith.addf %359, %361 : vector<16x32xf32>
    %363 = arith.addf %362, %267 : vector<16x32xf32>
    %c12 = arith.constant 12 : index
    %c0_164 = arith.constant 0 : index
    %364 = vector.load %arg5[%c12, %c0_164] : memref<18x128xf32, #tpu.memory_space<vmem>>, vector<1x32xf32>
    %c13 = arith.constant 13 : index
    %c0_165 = arith.constant 0 : index
    %365 = vector.load %arg5[%c13, %c0_165] : memref<18x128xf32, #tpu.memory_space<vmem>>, vector<1x32xf32>
    %cst_166 = arith.constant dense<0.000000e+00> : vector<16xf32>
    %366 = vector.multi_reduction <add>, %363, %cst_166 [1] : vector<16x32xf32> to vector<16xf32>
    %367 = vector.shape_cast %366 : vector<16xf32> to vector<16x1xf32>
    %cst_167 = arith.constant 3.200000e+01 : f32
    %368 = vector.broadcast %cst_167 : f32 to vector<16x1xf32>
    %369 = arith.divf %367, %368 : vector<16x1xf32>
    %370 = vector.broadcast %369 : vector<16x1xf32> to vector<16x32xf32>
    %371 = arith.subf %363, %370 : vector<16x32xf32>
    %372 = arith.mulf %371, %371 : vector<16x32xf32>
    %cst_168 = arith.constant dense<0.000000e+00> : vector<16xf32>
    %373 = vector.multi_reduction <add>, %372, %cst_168 [1] : vector<16x32xf32> to vector<16xf32>
    %374 = vector.shape_cast %373 : vector<16xf32> to vector<16x1xf32>
    %cst_169 = arith.constant 3.200000e+01 : f32
    %375 = vector.broadcast %cst_169 : f32 to vector<16x1xf32>
    %376 = arith.divf %374, %375 : vector<16x1xf32>
    %cst_170 = arith.constant 9.99999974E-6 : f32
    %377 = vector.broadcast %cst_170 : f32 to vector<16x1xf32>
    %378 = arith.addf %376, %377 : vector<16x1xf32>
    %379 = math.rsqrt %378 : vector<16x1xf32>
    %380 = vector.broadcast %379 : vector<16x1xf32> to vector<16x32xf32>
    %381 = arith.mulf %371, %380 : vector<16x32xf32>
    %382 = vector.broadcast %364 : vector<1x32xf32> to vector<16x32xf32>
    %383 = arith.mulf %381, %382 : vector<16x32xf32>
    %384 = vector.broadcast %365 : vector<1x32xf32> to vector<16x32xf32>
    %385 = arith.addf %383, %384 : vector<16x32xf32>
    %386 = vector.extract_strided_slice %269 {offsets = [0, 128], sizes = [32, 64], strides = [1, 1]} : vector<32x256xf32> to vector<32x64xf32>
    %cst_171 = arith.constant dense<0.000000e+00> : vector<16x64xf32>
    %387 = tpu.matmul %385, %386, %cst_171 {dimension_numbers = #tpu.dot_dimension_numbers<[1], [0], [0], [1], [0, 0, 1, 1], [], []>} : vector<16x32xf32>, vector<32x64xf32>, vector<16x64xf32> -> vector<16x64xf32>
    %c14 = arith.constant 14 : index
    %c0_172 = arith.constant 0 : index
    %388 = vector.load %arg5[%c14, %c0_172] : memref<18x128xf32, #tpu.memory_space<vmem>>, vector<1x64xf32>
    %389 = vector.broadcast %388 : vector<1x64xf32> to vector<16x64xf32>
    %390 = arith.addf %387, %389 : vector<16x64xf32>
    %cst_173 = arith.constant 5.000000e-01 : f32
    %391 = vector.broadcast %cst_173 : f32 to vector<16x64xf32>
    %392 = arith.mulf %391, %390 : vector<16x64xf32>
    %cst_174 = arith.constant 0.707106769 : f32
    %393 = vector.broadcast %cst_174 : f32 to vector<16x64xf32>
    %394 = arith.mulf %390, %393 : vector<16x64xf32>
    %395 = math.erf %394 : vector<16x64xf32>
    %cst_175 = arith.constant 1.000000e+00 : f32
    %396 = vector.broadcast %cst_175 : f32 to vector<16x64xf32>
    %397 = arith.addf %396, %395 : vector<16x64xf32>
    %398 = arith.mulf %392, %397 : vector<16x64xf32>
    %399 = vector.extract_strided_slice %269 {offsets = [0, 192], sizes = [32, 64], strides = [1, 1]} : vector<32x256xf32> to vector<32x64xf32>
    %cst_176 = arith.constant dense<0.000000e+00> : vector<16x32xf32>
    %400 = tpu.matmul %398, %399, %cst_176 {dimension_numbers = #tpu.dot_dimension_numbers<[1], [1], [0], [0], [0, 0, 1, 0], [], []>} : vector<16x64xf32>, vector<32x64xf32>, vector<16x32xf32> -> vector<16x32xf32>
    %c15 = arith.constant 15 : index
    %c0_177 = arith.constant 0 : index
    %401 = vector.load %arg5[%c15, %c0_177] : memref<18x128xf32, #tpu.memory_space<vmem>>, vector<1x32xf32>
    %402 = vector.broadcast %401 : vector<1x32xf32> to vector<16x32xf32>
    %403 = arith.addf %400, %402 : vector<16x32xf32>
    %404 = arith.addf %403, %385 : vector<16x32xf32>
    %c16_178 = arith.constant 16 : index
    %c0_179 = arith.constant 0 : index
    %405 = vector.load %arg5[%c16_178, %c0_179] : memref<18x128xf32, #tpu.memory_space<vmem>>, vector<1x32xf32>
    %c17 = arith.constant 17 : index
    %c0_180 = arith.constant 0 : index
    %406 = vector.load %arg5[%c17, %c0_180] : memref<18x128xf32, #tpu.memory_space<vmem>>, vector<1x32xf32>
    %cst_181 = arith.constant dense<0.000000e+00> : vector<16xf32>
    %407 = vector.multi_reduction <add>, %404, %cst_181 [1] : vector<16x32xf32> to vector<16xf32>
    %408 = vector.shape_cast %407 : vector<16xf32> to vector<16x1xf32>
    %cst_182 = arith.constant 3.200000e+01 : f32
    %409 = vector.broadcast %cst_182 : f32 to vector<16x1xf32>
    %410 = arith.divf %408, %409 : vector<16x1xf32>
    %411 = vector.broadcast %410 : vector<16x1xf32> to vector<16x32xf32>
    %412 = arith.subf %404, %411 : vector<16x32xf32>
    %413 = arith.mulf %412, %412 : vector<16x32xf32>
    %cst_183 = arith.constant dense<0.000000e+00> : vector<16xf32>
    %414 = vector.multi_reduction <add>, %413, %cst_183 [1] : vector<16x32xf32> to vector<16xf32>
    %415 = vector.shape_cast %414 : vector<16xf32> to vector<16x1xf32>
    %cst_184 = arith.constant 3.200000e+01 : f32
    %416 = vector.broadcast %cst_184 : f32 to vector<16x1xf32>
    %417 = arith.divf %415, %416 : vector<16x1xf32>
    %cst_185 = arith.constant 9.99999974E-6 : f32
    %418 = vector.broadcast %cst_185 : f32 to vector<16x1xf32>
    %419 = arith.addf %417, %418 : vector<16x1xf32>
    %420 = math.rsqrt %419 : vector<16x1xf32>
    %421 = vector.broadcast %420 : vector<16x1xf32> to vector<16x32xf32>
    %422 = arith.mulf %412, %421 : vector<16x32xf32>
    %423 = vector.broadcast %405 : vector<1x32xf32> to vector<16x32xf32>
    %424 = arith.mulf %422, %423 : vector<16x32xf32>
    %425 = vector.broadcast %406 : vector<1x32xf32> to vector<16x32xf32>
    %426 = arith.addf %424, %425 : vector<16x32xf32>
    %427 = vector.extract_strided_slice %426 {offsets = [0, 0], sizes = [1, 32], strides = [1, 1]} : vector<16x32xf32> to vector<1x32xf32>
    %428 = vector.extract_strided_slice %426 {offsets = [8, 0], sizes = [1, 32], strides = [1, 1]} : vector<16x32xf32> to vector<1x32xf32>
    %429 = tpu.concatenate %427, %428 in 0 : vector<1x32xf32>, vector<1x32xf32> -> vector<2x32xf32>
    %c0_186 = arith.constant 0 : index
    %c0_187 = arith.constant 0 : index
    %430 = vector.load %arg6[%c0_186, %c0_187] : memref<2x32xf32, #tpu.memory_space<vmem>>, vector<2x32xf32>
    tpu.vector_store %arg6[%c0_186, %c0_187], %429 {strides = array<i32>} : memref<2x32xf32, #tpu.memory_space<vmem>>, vector<2x32xf32>,
    return
  }
  func.func @transform_0(%arg0: i32, %arg1: memref<2x8xi32, #tpu.memory_space<smem>>) -> (i32, i32) {
    %c0_i32 = arith.constant 0 : i32
    %c0_i32_0 = arith.constant 0 : i32
    %c0_i32_1 = arith.constant 0 : i32
    return %c0_i32, %c0_i32_0 : i32, i32
  }
  func.func @transform_1(%arg0: i32, %arg1: memref<2x8xi32, #tpu.memory_space<smem>>) -> (i32, i32) {
    %c0_i32 = arith.constant 0 : i32
    %c0_i32_0 = arith.constant 0 : i32
    %c0_i32_1 = arith.constant 0 : i32
    return %c0_i32, %c0_i32_0 : i32, i32
  }
  func.func @transform_2(%arg0: i32, %arg1: memref<2x8xi32, #tpu.memory_space<smem>>) -> (i32, i32, i32) {
    %c0_i32 = arith.constant 0 : i32
    %c0_i32_0 = arith.constant 0 : i32
    %c0_i32_1 = arith.constant 0 : i32
    %c0_i32_2 = arith.constant 0 : i32
    return %c0_i32, %c0_i32_0, %c0_i32_1 : i32, i32, i32
  }
  func.func @transform_3(%arg0: i32, %arg1: memref<2x8xi32, #tpu.memory_space<smem>>) -> (i32, i32) {
    %c0_i32 = arith.constant 0 : i32
    %c0_i32_0 = arith.constant 0 : i32
    %c0_i32_1 = arith.constant 0 : i32
    return %c0_i32, %c0_i32_0 : i32, i32
  }
  func.func @transform_4(%arg0: i32, %arg1: memref<2x8xi32, #tpu.memory_space<smem>>) -> (i32, i32) {
    %c0_i32 = arith.constant 0 : i32
    %c0_i32_0 = arith.constant 0 : i32
    %c0_i32_1 = arith.constant 0 : i32
    return %c0_i32, %c0_i32_0 : i32, i32
  }
}

</mosaic_0001>

<bundles_post_ra>
// kernel: text_language_model_forward.1
= control target key start
LH: loop header
LB: loop body
LE: loop exit
PB: predicated region body
PF: predicated region fallthrough
CT: control target
= control target key end

     0   :  { %s5584_s0 = inlined_call_operand.vmem [shape: s32[2,8], index: 0, kind: input, shape index: {}]   ;;  %s5585_s1 = inlined_call_operand.vmem [shape: f32[128,32], index: 1, kind: input, shape index: {}]   ;;  %s5586_s2 = inlined_call_operand.vmem [shape: f32[8,32], index: 2, kind: input, shape index: {}]   ;;  %s5587_s3 = inlined_call_operand.vmem [shape: f32[2,32,256], index: 3, kind: input, shape index: {}]   ;;  %s5588_s4 = inlined_call_operand.vmem [shape: f32[18,128], index: 4, kind: input, shape index: {}]   ;;  %s5589_s5 = inlined_call_operand.hbm [shape: f32[2,32], index: 5, kind: output, shape index: {}]  }
   0x1   :  { %s10_s20 = sshll.u32 %s5584_s0, 4  ;;  %s11_s20 = int_to_ptr.vmem [resolvable:$true] %s10_s20 }
   0x2   :  { %s4769_s21 = scalar_lea.vmem %s11_s20, 32  ;;  %p4774_p1 = scmp.lt.s32.totalorder %s11_s20, %s11_s20 }
   0x3   :  { %p4770_p0 = scmp.ne.s32.totalorder %s11_s20, %s4769_s21  ;;  %p4775_p2 = scmp.lt.s32.totalorder %s4769_s21, %s4769_s21 }
   0x5   :  { %p4776_p3 = por %p4775_p2, %p4774_p1 }
   0x7   :  { %p4777_p4 = pnand %p4776_p3, %p4770_p0 }
   0x9   :  { %4780 = shalt.err (!%p4777_p4)  }
   0xa   :  { %s4807_s22 = smov [#allocation4]  }
   0xb   :  { %13 = dma.vmem_to_smem %s11_s20, 32, %s4807_s22, [#allocation3] }
   0xc   :  { %4803 = dma.done.wait [#allocation3], 32 }
   0xd   :  { %4804 = vsyncadd [#allocation3], 4294967264 }
   0xe   :  { %15 = sfence }
   0xf   :  { %v128_v0 = vld [vmem:[%s5585_s1] sm:$0xff]  ;;  %v129_v1 = vld [vmem:[%s5585_s1 + $0x8] sm:$0xff]  ;;  %v130_v2 = vld [vmem:[%s5585_s1 + $0x10] sm:$0xff]  ;;  %v25_v3 = vlaneseq  ;;  %s4868_s28 = sld [smem:[#allocation4]]  ;;  %s4879_s10 = sld [smem:[#allocation4 + $0x1]]  ;;  %vm107_vm0 = vcmask 1040384  }
  0x10   :  { %v4514_v4 = vpack.c.bf16 %v129_v1, %v128_v0  ;;  %v131_v5 = vld [vmem:[%s5585_s1 + $0x18] sm:$0xff]  ;;  %v132_v6 = vld [vmem:[%s5585_s1 + $0x20] sm:$0xff]  ;;  %v133_v7 = vld [vmem:[%s5585_s1 + $0x28] sm:$0xff]  ;;  %s4890_s17 = sld [smem:[#allocation4 + $0x2]]  ;;  %s4903_s24 = sld [smem:[#allocation4 + $0x3]]  ;;  %vm109_vm1 = vcmask 1041408  }
  0x11   :  { %v4518_v8 = vpack.c.bf16 %v131_v5, %v130_v2  ;;  %v134_v9 = vld [vmem:[%s5585_s1 + $0x30] sm:$0xff]  ;;  %v135_v10 = vld [vmem:[%s5585_s1 + $0x38] sm:$0xff]  ;;  %v136_v11 = vld [vmem:[%s5585_s1 + $0x40] sm:$0xff]  ;;  %v4901_v15 = vand.u32 127, %v25_v3  ;;  %s4905_s25 = sld [smem:[#allocation4 + $0x4]]  ;;  %v4522_v16 = vpack.c.bf16 %v133_v7, %v132_v6  ;;  %s4907_s26 = sld [smem:[#allocation4 + $0x5]] }
  0x12   :  { %4515 = vmatprep.subr.bf16.mxu0 %v4514_v4  ;;  %v137_v12 = vld [vmem:[%s5585_s1 + $0x48] sm:$0xff]  ;;  %v138_v13 = vld [vmem:[%s5585_s1 + $0x50] sm:$0xff]  ;;  %v139_v14 = vld [vmem:[%s5585_s1 + $0x58] sm:$0xff]  ;;  %v4526_v17 = vpack.c.bf16 %v135_v10, %v134_v9  ;;  %s4909_s0 = sld [smem:[#allocation4 + $0x6]]  ;;  %s4916_s27 = sld [smem:[#allocation4 + $0x7]]  ;;  %vm111_vm2 = vcmask 1042432  }
  0x13   :  { %4517 = vmatpush3.bf16.msra.mxu0 %v4514_v4  ;;  %v4911_v18 = vpack.c.bf16 %v137_v12, %v136_v11  ;;  %v4913_v19 = vpack.c.bf16 %v139_v14, %v138_v13  ;;  %s4918_s29 = sld [smem:[#allocation4 + $0x80]]  ;;  %vm113_vm4 = vcmask 1043456   ;;  %vm115_vm5 = vcmask 1044480   ;;  %s4922_s30 = sld [smem:[#allocation4 + $0x81]] }
  0x14   :  { %4519 = vmatprep.subr.bf16.mxu0 %v4518_v8  ;;  %s4924_s6 = sld [smem:[#allocation4 + $0x82]]  ;;  %v4808_v22 = vmov 0.0   ;;  %vm117_vm7 = vcmask 1045504   ;;  %vm119_vm9 = vcmask 1046528   ;;  %s4934_s7 = sld [smem:[#allocation4 + $0x84]] }
  0x15   :  { %v28_v20 = vstv %s4868_s28  ;;  %v33_v21 = vstv %s4879_s10  ;;  %s4932_s28 = sld [smem:[#allocation4 + $0x83]]  ;;  %s4940_s8 = sld [smem:[#allocation4 + $0x85]] }
  0x16   :  { %vm29_vm3 = vcmp.eq.s32.totalorder %v4901_v15, %v28_v20  ;;  %vm34_vm6 = vcmp.eq.s32.totalorder %v4901_v15, %v33_v21  ;;  %v38_v24 = vstv %s4890_s17  ;;  %v43_v26 = vstv %s4903_s24 }
  0x17   :  { %4521 = vmatpush3.bf16.msra.mxu0 %v4518_v8  ;;  %v3972_v23 = vsel %vm29_vm3, 1.0, %v4808_v22  ;;  %v3974_v25 = vsel %vm34_vm6, 1.0, %v4808_v22  ;;  %vm39_vm8 = vcmp.eq.s32.totalorder %v4901_v15, %v38_v24  ;;  %vm44_vm10 = vcmp.eq.s32.totalorder %v4901_v15, %v43_v26 }
  0x18   :  { %4523 = vmatprep.subr.bf16.mxu0 %v4522_v16  ;;  %v3976_v27 = vsel %vm39_vm8, 1.0, %v4808_v22  ;;  %v48_v28 = vstv %s4905_s25  ;;  %v108_v29 = vsel %vm107_vm0, %v3972_v23, %v3974_v25 }
  0x19   :  { %16 = vsyncpa [#allocation6], 0  ;;  %v3978_v30 = vsel %vm44_vm10, 1.0, %v4808_v22  ;;  %vm49_vm11 = vcmp.eq.s32.totalorder %v4901_v15, %v48_v28  ;;  %v53_v31 = vstv %s4907_s26  ;;  %v58_v32 = vstv %s4909_s0  ;;  %s4950_s9 = sld [smem:[#allocation4 + $0x86]]  ;;  %s4964_s10 = sld [smem:[#allocation4 + $0x87]]  ;;  %v140_v51 = vld [vmem:[%s5585_s1 + $0x60] sm:$0xff] }
  0x1a   :  { %v3980_v33 = vsel %vm49_vm11, 1.0, %v4808_v22  ;;  %vm54_vm12 = vcmp.eq.s32.totalorder %v4901_v15, %v53_v31  ;;  %vm59_vm13 = vcmp.eq.s32.totalorder %v4901_v15, %v58_v32  ;;  %v63_v34 = vstv %s4916_s27  ;;  %v141_v52 = vld [vmem:[%s5585_s1 + $0x68] sm:$0xff]  ;;  %v142_v61 = vld [vmem:[%s5585_s1 + $0x70] sm:$0xff]  ;;  %v143_v62 = vld [vmem:[%s5585_s1 + $0x78] sm:$0xff]  ;;  %s4814_s11 = smov 80   ;;  %s4815_s12 = smov 104  }
  0x1b   :  { %4525 = vmatpush3.bf16.msra.mxu0 %v4522_v16  ;;  %v3982_v35 = vsel %vm54_vm12, 1.0, %v4808_v22  ;;  %v3984_v36 = vsel %vm59_vm13, 1.0, %v4808_v22  ;;  %vm64_vm14 = vcmp.eq.s32.totalorder %v4901_v15, %v63_v34  ;;  %v110_v37 = vsel %vm109_vm1, %v108_v29, %v3976_v27  ;;  %v144_v9 = vld [vmem:[%s5586_s2] sm:$0xff]  ;;  %v5027_v28 = vld [vmem:[%s5587_s3 + $0x10] sm:$0xff]  ;;  %s4816_s13 = smov 72   ;;  %s4817_s14 = smov 56  }
  0x1c   :  { %4527 = vmatprep.subr.bf16.mxu0 %v4526_v17  ;;  %v3986_v38 = vsel %vm64_vm14, 1.0, %v4808_v22  ;;  %v112_v39 = vsel %vm111_vm2, %v110_v37, %v3978_v30  ;;  %v68_v40 = vstv %s4918_s29  ;;  %v73_v41 = vstv %s4922_s30  ;;  %v5022_v27 = vld [vmem:[%s5587_s3] sm:$0xff]  ;;  %v5041_v32 = vld [vmem:[%s5587_s3 + $0x30] sm:$0xff]  ;;  %s4818_s15 = smov 64   ;;  %s4819_s16 = smov 48  }
  0x1d   :  { %v114_v42 = vsel %vm113_vm4, %v112_v39, %v3980_v33  ;;  %vm69_vm15 = vcmp.eq.s32.totalorder %v4901_v15, %v68_v40  ;;  %vm74_vm3 = vcmp.eq.s32.totalorder %v4901_v15, %v73_v41  ;;  %v78_v43 = vstv %s4924_s6  ;;  %v5032_v29 = vld [vmem:[%s5587_s3 + $0x20] sm:$0xff]  ;;  %s4820_s17 = smov 40   ;;  %s4821_s18 = smov 32  }
  0x1e   :  { %v116_v44 = vsel %vm115_vm5, %v114_v42, %v3982_v35  ;;  %v3988_v45 = vsel %vm69_vm15, 1.0, %v4808_v22  ;;  %v3990_v46 = vsel %vm74_vm3, 1.0, %v4808_v22  ;;  %vm79_vm6 = vcmp.eq.s32.totalorder %v4901_v15, %v78_v43  ;;  %v4003_v41 = vld [vmem:[%s5588_s4] ss:$0 sm:$0xff]  ;;  %v4004_v43 = vld [vmem:[%s5588_s4 + $0x1] ss:$0 sm:$0xff] }
  0x1f   :  { %4529 = vmatpush3.bf16.msra.mxu0 %v4526_v17  ;;  %v118_v47 = vsel %vm117_vm7, %v116_v44, %v3984_v36  ;;  %v3992_v48 = vsel %vm79_vm6, 1.0, %v4808_v22  ;;  %v83_v49 = vstv %s4932_s28  ;;  %v88_v50 = vstv %s4934_s7  ;;  %s4810_s7 = smov 88   ;;  %s4822_s1 = smov 8  }
  0x20   :  { %4531 = vmatprep.subr.bf16.mxu0 %v4911_v18  ;;  %v120_v53 = vsel %vm119_vm9, %v118_v47, %v3986_v38  ;;  %vm84_vm8 = vcmp.eq.s32.totalorder %v4901_v15, %v83_v49  ;;  %vm89_vm10 = vcmp.eq.s32.totalorder %v4901_v15, %v88_v50  ;;  %v93_v54 = vstv %s4940_s8  ;;  %v4005_v50 = vld [vmem:[%s5588_s4 + $0x2] ss:$0 sm:$0xff]  ;;  %s4811_s8 = smov 96   ;;  %s4823_s19 = smov 24  }
  0x21   :  { %4263 = vmatprep.mubr.f32.mxu0 %v120_v53  ;;  %v3994_v55 = vsel %vm84_vm8, 1.0, %v4808_v22  ;;  %v3996_v56 = vsel %vm89_vm10, 1.0, %v4808_v22  ;;  %vm94_vm11 = vcmp.eq.s32.totalorder %v4901_v15, %v93_v54  ;;  %v98_v57 = vstv %s4950_s9  ;;  %s4812_s9 = smov 120   ;;  %s4824_s2 = smov 16  }
  0x22   :  { %v121_v58 = vsel %vm107_vm0, %v3988_v45, %v3990_v46  ;;  %v4538_v59 = vpack.c.bf16 %v141_v52, %v140_v51  ;;  %v3998_v0 = vsel %vm94_vm11, 1.0, %v4808_v22  ;;  %vm99_vm12 = vcmp.eq.s32.totalorder %v4901_v15, %v98_v57  ;;  %s4825_s28 = smov [#allocation5]  }
  0x23   :  { %4533 = vmatpush3.bf16.msra.mxu0 %v4911_v18  ;;  %v122_v60 = vsel %vm109_vm1, %v121_v58, %v3992_v48  ;;  %v103_v1 = vstv %s4964_s10  ;;  %v4542_v3 = vpack.c.bf16 %v143_v62, %v142_v61  ;;  %v4000_v4 = vsel %vm99_vm12, 1.0, %v4808_v22  ;;  %s4813_s10 = smov 112   ;;  %s3964_s20 = sshll.u32 %s4825_s28, 4  ;;  %s3965_s20 = int_to_ptr.vmem [resolvable:$true] %s3964_s20 }
  0x24   :  { %4535 = vmatprep.subr.bf16.mxu0 %v4913_v19  ;;  %v123_v63 = vsel %vm111_vm2, %v122_v60, %v3994_v55  ;;  %vm104_vm1 = vcmp.eq.s32.totalorder %v4901_v15, %v103_v1  ;;  %vm222_vm2 = vcmask 261120   ;;  %v4637_v30 = vpack.i.bf16 %v5027_v28, %v5022_v27  ;;  %s4781_s21 = scalar_lea.vmem %s3965_s20, 32  ;;  %p4786_p6 = scmp.lt.s32.totalorder %s3965_s20, %s3965_s20 }
  0x25   :  { %v124_v2 = vsel %vm113_vm4, %v123_v63, %v3996_v56  ;;  %v4002_v6 = vsel %vm104_vm1, 1.0, %v4808_v22  ;;  %v4546_v31 = vpack.c.bf16 %v5027_v28, %v5022_v27  ;;  %v4550_v33 = vpack.c.bf16 %v5041_v32, %v5032_v29  ;;  %p4782_p5 = scmp.ne.s32.totalorder %s3965_s20, %s4781_s21  ;;  %p4787_p7 = scmp.lt.s32.totalorder %s4781_s21, %s4781_s21 }
  0x26   :  { %v125_v5 = vsel %vm115_vm5, %v124_v2, %v3998_v0  ;;  %vm4809_vm4 = vmmov 0   ;;  %vm359_vm5 = vcmask 64512   ;;  %vm1396_vm13 = vcmask 261312  }
  0x27   :  { %4537 = vmatpush3.bf16.msra.mxu0 %v4913_v19  ;;  %v126_v7 = vsel %vm117_vm7, %v125_v5, %v4000_v4  ;;  %4547 = vmatprep.subr.bf16.mxu1 %v4546_v31  ;;  %vm1232_vm7 = vcmask 130112   ;;  %vm1977_vm14 = vcmask 523264   ;;  %vm3956_vm3 = vcmask 254976   ;;  %p4788_p8 = por %p4787_p7, %p4786_p6 }
  0x28   :  { %4539 = vmatprep.subr.bf16.mxu0 %v4538_v59  ;;  %v127_v8 = vsel %vm119_vm9, %v126_v7, %v4002_v6  ;;  %4549 = vmatpush3.bf16.msra.mxu1 %v4546_v31  ;;  %vm1314_vm9 = vcmask 195712   ;;  %vm5271_vm15 = vmpackc.low %vm1977_vm14, %vm1977_vm14 }
  0x29   :  { %4551 = vmatprep.subr.bf16.mxu1 %v4550_v33  ;;  %p4789_p9 = pnand %p4788_p8, %p4782_p5 }
  0x2b   :  { %4541 = vmatpush3.bf16.msra.mxu0 %v4538_v59 }
  0x2c   :  { %4543 = vmatprep.subr.bf16.mxu0 %v4542_v3  ;;  %4553 = vmatpush3.bf16.msra.mxu1 %v4550_v33 }
  0x2d   :  { %4277 = vmatprep.subr.mxu1 %v4808_v22 }
  0x2f   :  { %4545 = vmatpush3.bf16.msra.mxu0 %v4542_v3 }
  0x30   :  { %4307 = vmatprep.subr.mxu0 %v4808_v22 }
  0x32   :  { %4264 = vmatmul.mubr.f32.vlgmr.msra.gmra.mrb[0].mxu0 %v127_v8 }
  0x33   :  { %4309 = vmatprep.mubr.msk.f32.mxu0 %vm4809_vm4, %v4808_v22 }
 0x105   :  { %v4265_v10 = vpop.f32.mrb[0].mxu0 }
 0x106   :  { %v211_v11 = vpop.f32.mrb[1].mxu0  ;;  %v217_v13 = vadd.f32 %v4265_v10, %v144_v9 }
 0x107   :  { %v212_v12 = vadd.f32 %v211_v11, %v144_v9 }
 0x108   :  { %v226_v15 = vsel %vm222_vm2, %v217_v13, 0.0 }
 0x109   :  { %v223_v14 = vsel %vm222_vm2, %v212_v12, 0.0 }
 0x10a   :  { %224 = vadd.xlane.f32.xlu0 %v223_v14 }
 0x10e   :  { %227 = vadd.xlane.f32.xlu0 %v226_v15 }
 0x197   :  { %v225_v16 = vpop.xlane.xlu0 %224 }
 0x198   :  { %v230_v17 = vmul.f32 0.03125, %v225_v16 }
 0x19a   :  { %v232_v18 = vsub.f32 %v212_v12, %v230_v17 }
 0x19b   :  { %v228_v19 = vpop.xlane.xlu0 %227 }
 0x19c   :  { %v231_v20 = vmul.f32 0.03125, %v228_v19  ;;  %v234_v21 = vmul.f32 %v232_v18, %v232_v18 }
 0x19e   :  { %v233_v23 = vsub.f32 %v217_v13, %v231_v20  ;;  %v236_v24 = vsel %vm222_vm2, %v234_v21, 0.0 }
 0x19f   :  { %237 = vadd.xlane.f32.xlu1 %v236_v24 }
 0x1a0   :  { %v235_v25 = vmul.f32 %v233_v23, %v233_v23 }
 0x1a2   :  { %v239_v26 = vsel %vm222_vm2, %v235_v25, 0.0 }
 0x1a3   :  { %240 = vadd.xlane.f32.xlu1 %v239_v26 }
 0x22c   :  { %v238_v34 = vpop.xlane.xlu1 %237 }
 0x22d   :  { %v242_v35 = vmul.f32 0.03125, %v238_v34 }
 0x22f   :  { %v244_v36 = vadd.f32 1e-05, %v242_v35 }
 0x230   :  { %v241_v37 = vpop.xlane.xlu1 %240 }
 0x231   :  { %4677 = vrsqrt.f32 %v244_v36  ;;  %v243_v38 = vmul.f32 0.03125, %v241_v37 }
 0x233   :  { %v245_v39 = vadd.f32 1e-05, %v243_v38 }
 0x235   :  { %4679 = vrsqrt.f32 %v245_v39 }
 0x23b   :  { %v4678_v40 = vpop.eup %4677 }
 0x23c   :  { %v248_v42 = vmul.f32 %v4678_v40, %v232_v18 }
 0x23e   :  { %v254_v44 = vmul.f32 %v4003_v41, %v248_v42 }
 0x23f   :  { %v4680_v45 = vpop.eup %4679 }
 0x240   :  { %v249_v46 = vmul.f32 %v4680_v45, %v233_v23  ;;  %v5052_v47 = vadd.f32 %v4004_v43, %v254_v44 }
 0x242   :  { %v255_v48 = vmul.f32 %v4003_v41, %v249_v46  ;;  %4274 = vmatprep.mubr.msk.f32.mxu1 %vm222_vm2, %v5052_v47 }
 0x244   :  { %v5056_v49 = vadd.f32 %v4004_v43, %v255_v48 }
 0x246   :  { %4275 = vmatmul.mubr.msk.f32.vlgmr.msra.gmra.mrb[0].mxu1 %vm222_vm2, %v5056_v49 }
 0x247   :  { %4279 = vmatprep.mubr.msk.f32.mxu1 %vm4809_vm4, %v4808_v22 }
 0x319   :  { %v4276_v51 = vpop.f32.mrb[0].mxu1 }
 0x31a   :  { %v347_v52 = vpop.f32.mrb[1].mxu1  ;;  %v5081_v54 = vadd.f32 %v4276_v51, %v4005_v50 }
 0x31b   :  { %v5067_v53 = vadd.f32 %v4005_v50, %v347_v52 }
 0x31d   :  { %437 = vrot.lane.b32.xlu1 %v5067_v53, %s4810_s7  ;;  %357 = vrot.lane.b32.xlu0 %v5067_v53, %s4811_s8 }
 0x321   :  { %435 = vrot.lane.b32.xlu1 %v5067_v53, %s4812_s9  ;;  %514 = vrot.lane.b32.xlu0 %v5067_v53, %s4813_s10 }
 0x325   :  { %516 = vrot.lane.b32.xlu1 %v5067_v53, %s4814_s11  ;;  %593 = vrot.lane.b32.xlu0 %v5067_v53, %s4815_s12 }
 0x329   :  { %595 = vrot.lane.b32.xlu1 %v5067_v53, %s4816_s13  ;;  %752 = vrot.lane.b32.xlu0 %v5081_v54, %s4810_s7 }
 0x32d   :  { %673 = vrot.lane.b32.xlu1 %v5081_v54, %s4811_s8  ;;  %831 = vrot.lane.b32.xlu0 %v5081_v54, %s4814_s11 }
 0x331   :  { %750 = vrot.lane.b32.xlu1 %v5081_v54, %s4812_s9  ;;  %829 = vrot.lane.b32.xlu0 %v5081_v54, %s4813_s10 }
 0x335   :  { %910 = vrot.lane.b32.xlu1 %v5081_v54, %s4816_s13 }
 0x339   :  { %908 = vrot.lane.b32.xlu1 %v5081_v54, %s4815_s12 }
 0x38f   :  { %v438_v55 = vpop.permute.xlu1 %437  ;;  %v358_v56 = vpop.permute.xlu0 %357 }
 0x390   :  { %4278 = vmatpush3.xpose.msk.msra.mxu1 %vm359_vm5, %v358_v56 }
 0x391   :  { %4282 = vmatprep.subr.mxu1 %v4808_v22 }
 0x393   :  { %v436_v57 = vpop.permute.xlu1 %435  ;;  %4280 = vmatmul.mubr.msk.f32.vlgmr.msra.gmra.mrb[2].mxu1 %vm359_vm5, %v5067_v53  ;;  %v515_v58 = vpop.permute.xlu0 %514 }
 0x394   :  { %4283 = vmatpush3.xpose.msk.msra.mxu1 %vm359_vm5, %v438_v55  ;;  %4284 = vmatprep.mubr.msk.f32.mxu1 %vm4809_vm4, %v4808_v22 }
 0x395   :  { %4287 = vmatprep.subr.mxu1 %v4808_v22 }
 0x397   :  { %v517_v59 = vpop.permute.xlu1 %516  ;;  %4285 = vmatmul.mubr.msk.f32.vlgmr.msra.gmra.mrb[4].mxu1 %vm359_vm5, %v436_v57  ;;  %v594_v60 = vpop.permute.xlu0 %593 }
 0x398   :  { %4288 = vmatpush3.xpose.msk.msra.mxu1 %vm359_vm5, %v517_v59  ;;  %4289 = vmatprep.mubr.msk.f32.mxu1 %vm4809_vm4, %v4808_v22 }
 0x399   :  { %4292 = vmatprep.subr.mxu1 %v4808_v22 }
 0x39b   :  { %v596_v61 = vpop.permute.xlu1 %595  ;;  %4290 = vmatmul.mubr.msk.f32.vlgmr.msra.gmra.mrb[6].mxu1 %vm359_vm5, %v515_v58  ;;  %v753_v62 = vpop.permute.xlu0 %752 }
 0x39c   :  { %4293 = vmatpush3.xpose.msk.msra.mxu1 %vm359_vm5, %v596_v61  ;;  %4294 = vmatprep.mubr.msk.f32.mxu1 %vm4809_vm4, %v4808_v22 }
 0x39d   :  { %4297 = vmatprep.subr.mxu1 %v4808_v22 }
 0x39f   :  { %v674_v63 = vpop.permute.xlu1 %673  ;;  %4295 = vmatmul.mubr.msk.f32.vlgmr.msra.gmra.mrb[8].mxu1 %vm359_vm5, %v594_v60  ;;  %v832_v0 = vpop.permute.xlu0 %831 }
 0x3a0   :  { %4298 = vmatpush3.xpose.msk.msra.mxu1 %vm359_vm5, %v674_v63  ;;  %4308 = vmatpush3.xpose.msk.msra.mxu0 %vm359_vm5, %v832_v0 }
 0x3a1   :  { %4299 = vmatprep.mubr.msk.f32.mxu1 %vm4809_vm4, %v4808_v22  ;;  %4302 = vmatprep.subr.mxu1 %v4808_v22 }
 0x3a2   :  { %4317 = vmatprep.subr.mxu0 %v4808_v22 }
 0x3a3   :  { %v751_v1 = vpop.permute.xlu1 %750  ;;  %4300 = vmatmul.mubr.msk.f32.vlgmr.msra.gmra.mrb[10].mxu1 %vm359_vm5, %v5081_v54  ;;  %v830_v2 = vpop.permute.xlu0 %829 }
 0x3a4   :  { %4303 = vmatpush3.xpose.msk.msra.mxu1 %vm359_vm5, %v753_v62  ;;  %4310 = vmatmul.mubr.msk.f32.vlgmr.msra.gmra.mrb[2].mxu0 %vm359_vm5, %v830_v2 }
 0x3a5   :  { %4304 = vmatprep.mubr.msk.f32.mxu1 %vm4809_vm4, %v4808_v22  ;;  %4312 = vmatprep.subr.mxu1 %v4808_v22 }
 0x3a6   :  { %4319 = vmatprep.mubr.msk.f32.mxu0 %vm4809_vm4, %v4808_v22 }
 0x3a7   :  { %v911_v3 = vpop.permute.xlu1 %910  ;;  %4305 = vmatmul.mubr.msk.f32.vlgmr.msra.gmra.mrb[12].mxu1 %vm359_vm5, %v751_v1 }
 0x3a8   :  { %4313 = vmatpush3.xpose.msk.msra.mxu1 %vm359_vm5, %v911_v3  ;;  %4314 = vmatprep.mubr.msk.f32.mxu1 %vm4809_vm4, %v4808_v22 }
 0x3a9   :  { %4322 = vmatprep.subr.mxu1 %v4808_v22 }
 0x3ab   :  { %v909_v4 = vpop.permute.xlu1 %908 }
 0x3ac   :  { %4315 = vmatmul.mubr.msk.f32.vlgmr.msra.gmra.mrb[14].mxu1 %vm359_vm5, %v909_v4 }
 0x3ad   :  { %4324 = vmatprep.mubr.msk.f32.mxu1 %vm4809_vm4, %v4808_v22 }
 0x466   :  { %v430_v5 = vpop.f32.mrb[2].mxu1 }
 0x467   :  { %v5141_v6 = vmul.f32 0.35355338, %v430_v5  ;;  %v4281_v7 = vpop.f32.mrb[3].mxu1 }
 0x469   :  { %v987_v8 = vsel %vm359_vm5, %v5141_v6, -inf }
 0x46a   :  { %988 = vmax.xlane.f32.xlu0 %v987_v8  ;;  %v509_v9 = vpop.f32.mrb[4].mxu1 }
 0x46b   :  { %v513_v10 = vmul.f32 0.35355338, %v509_v9  ;;  %v4286_v11 = vpop.f32.mrb[5].mxu1 }
 0x46d   :  { %v990_v12 = vsel %vm359_vm5, %v513_v10, -inf }
 0x46e   :  { %991 = vmax.xlane.f32.xlu1 %v990_v12  ;;  %v588_v13 = vpop.f32.mrb[6].mxu1 }
 0x46f   :  { %v5146_v14 = vmul.f32 0.35355338, %v588_v13  ;;  %v4291_v15 = vpop.f32.mrb[7].mxu1 }
 0x471   :  { %v993_v16 = vsel %vm359_vm5, %v5146_v14, -inf }
 0x472   :  { %994 = vmax.xlane.f32.xlu0 %v993_v16  ;;  %v667_v17 = vpop.f32.mrb[8].mxu1 }
 0x473   :  { %v671_v18 = vmul.f32 0.35355338, %v667_v17  ;;  %v4296_v19 = vpop.f32.mrb[9].mxu1 }
 0x475   :  { %v996_v20 = vsel %vm359_vm5, %v671_v18, -inf }
 0x476   :  { %997 = vmax.xlane.f32.xlu0 %v996_v20  ;;  %v745_v21 = vpop.f32.mrb[10].mxu1 }
 0x477   :  { %v5151_v23 = vmul.f32 0.35355338, %v745_v21  ;;  %v4301_v24 = vpop.f32.mrb[11].mxu1  ;;  %v903_v25 = vpop.f32.mrb[2].mxu0 }
 0x478   :  { %v4311_v26 = vpop.f32.mrb[3].mxu0  ;;  %v907_v31 = vmul.f32 0.35355338, %v903_v25 }
 0x479   :  { %v999_v33 = vsel %vm359_vm5, %v5151_v23, -inf }
 0x47a   :  { %1000 = vmax.xlane.f32.xlu0 %v999_v33  ;;  %v824_v34 = vpop.f32.mrb[12].mxu1  ;;  %v1005_v38 = vsel %vm359_vm5, %v907_v31, -inf }
 0x47b   :  { %v828_v35 = vmul.f32 0.35355338, %v824_v34  ;;  %v4306_v36 = vpop.f32.mrb[13].mxu1 }
 0x47d   :  { %v1002_v37 = vsel %vm359_vm5, %v828_v35, -inf }
 0x47e   :  { %1003 = vmax.xlane.f32.xlu1 %v1002_v37  ;;  %1006 = vmax.xlane.f32.xlu0 %v1005_v38 }
 0x47f   :  { %v982_v39 = vpop.f32.mrb[14].mxu1 }
 0x480   :  { %v986_v40 = vmul.f32 0.35355338, %v982_v39  ;;  %v4316_v41 = vpop.f32.mrb[15].mxu1 }
 0x482   :  { %v1008_v42 = vsel %vm359_vm5, %v986_v40, -inf }
 0x483   :  { %1009 = vmax.xlane.f32.xlu1 %v1008_v42 }
 0x494   :  { %1152 = vrot.lane.b32.xlu1 %v5067_v53, %s4817_s14  ;;  %1075 = vrot.lane.b32.xlu0 %v5067_v53, %s4818_s15 }
 0x498   :  { %1234 = vrot.lane.b32.xlu1 %v5067_v53, %s4819_s16  ;;  %1398 = vrot.lane.b32.xlu0 %v5081_v54, %s4818_s15 }
 0x49c   :  { %1316 = vrot.lane.b32.xlu1 %v5067_v53, %s4820_s17 }
 0x4a0   :  { %1475 = vrot.lane.b32.xlu1 %v5081_v54, %s4817_s14 }
 0x4f7   :  { %v989_v43 = vpop.xlane.xlu0 %988 }
 0x4f8   :  { %v1011_v57 = vsub.f32 %v5141_v6, %v989_v43 }
 0x4fa   :  { %v1019_v62 = vmul.f32 1.442695, %v1011_v57 }
 0x4fb   :  { %v992_v44 = vpop.xlane.xlu1 %991 }
 0x4fc   :  { %v1012_v45 = vsub.f32 %v513_v10, %v992_v44 }
 0x4fe   :  { %v1021_v46 = vmul.f32 1.442695, %v1012_v45 }
 0x4ff   :  { %v995_v48 = vpop.xlane.xlu0 %994 }
 0x500   :  { %4681 = vpow2.f32 %v1021_v46  ;;  %v1013_v1 = vsub.f32 %v5146_v14, %v995_v48 }
 0x502   :  { %v1023_v6 = vmul.f32 1.442695, %v1013_v1 }
 0x503   :  { %v998_v50 = vpop.xlane.xlu0 %997 }
 0x504   :  { %v1014_v51 = vsub.f32 %v671_v18, %v998_v50 }
 0x506   :  { %v1025_v52 = vmul.f32 1.442695, %v1014_v51 }
 0x507   :  { %v1001_v55 = vpop.xlane.xlu0 %1000 }
 0x508   :  { %4683 = vpow2.f32 %v1025_v52  ;;  %v1015_v7 = vsub.f32 %v5151_v23, %v1001_v55 }
 0x50a   :  { %v4682_v56 = vpop.eup %4681  ;;  %v1027_v11 = vmul.f32 1.442695, %v1015_v7 }
 0x50b   :  { %v1004_v58 = vpop.xlane.xlu1 %1003  ;;  %v1007_v59 = vpop.xlane.xlu0 %1006  ;;  %v1038_v53 = vsel %vm359_vm5, %v4682_v56, 0.0 }
 0x50c   :  { %v1016_v60 = vsub.f32 %v828_v35, %v1004_v58  ;;  %v1017_v61 = vsub.f32 %v907_v31, %v1007_v59  ;;  %1039 = vadd.xlane.f32.xlu1 %v1038_v53 }
 0x50e   :  { %v1029_v63 = vmul.f32 1.442695, %v1016_v60  ;;  %v1031_v0 = vmul.f32 1.442695, %v1017_v61 }
 0x50f   :  { %v1076_v2 = vpop.permute.xlu0 %1075 }
 0x510   :  { %4685 = vpow2.f32 %v1029_v63  ;;  %v1010_v3 = vpop.xlane.xlu1 %1009  ;;  %4318 = vmatpush3.msra.mxu0 %v1076_v2 }
 0x511   :  { %4687 = vpow2.f32 %v1031_v0  ;;  %v1018_v4 = vsub.f32 %v986_v40, %v1010_v3  ;;  %4327 = vmatprep.subr.mxu0 %v4808_v22 }
 0x512   :  { %v4684_v5 = vpop.eup %4683  ;;  %4689 = vpow2.f32 %v1019_v62 }
 0x513   :  { %v1033_v8 = vmul.f32 1.442695, %v1018_v4  ;;  %v1044_v9 = vsel %vm359_vm5, %v4684_v5, 0.0  ;;  %v1399_v37 = vpop.permute.xlu0 %1398 }
 0x514   :  { %v1153_v10 = vpop.permute.xlu1 %1152  ;;  %1045 = vadd.xlane.f32.xlu1 %v1044_v9 }
 0x515   :  { %4691 = vpow2.f32 %v1033_v8  ;;  %4323 = vmatpush3.msra.mxu1 %v1153_v10 }
 0x516   :  { %4332 = vmatprep.subr.mxu1 %v4808_v22  ;;  %4693 = vpow2.f32 %v1023_v6 }
 0x517   :  { %4695 = vpow2.f32 %v1027_v11 }
 0x518   :  { %v1235_v25 = vpop.permute.xlu1 %1234 }
 0x51a   :  { %v4686_v12 = vpop.eup %4685 }
 0x51b   :  { %v5177_v13 = vpop.eup %4687  ;;  %v1050_v14 = vsel %vm359_vm5, %v4686_v12, 0.0 }
 0x51c   :  { %v4690_v15 = vpop.eup %4689  ;;  %1051 = vadd.xlane.f32.xlu1 %v1050_v14  ;;  %v1053_v16 = vsel %vm359_vm5, %v5177_v13, 0.0  ;;  %v1317_v26 = vpop.permute.xlu1 %1316 }
 0x51d   :  { %1054 = vadd.xlane.f32.xlu0 %v1053_v16  ;;  %v1035_v18 = vsel %vm359_vm5, %v4690_v15, 0.0 }
 0x51f   :  { %v4692_v17 = vpop.eup %4691 }
 0x520   :  { %v1056_v19 = vsel %vm359_vm5, %v4692_v17, 0.0  ;;  %v4694_v20 = vpop.eup %4693  ;;  %v1476_v31 = vpop.permute.xlu1 %1475 }
 0x521   :  { %1036 = vadd.xlane.f32.xlu0 %v1035_v18  ;;  %1057 = vadd.xlane.f32.xlu1 %v1056_v19  ;;  %v1041_v21 = vsel %vm359_vm5, %v4694_v20, 0.0  ;;  %v4696_v23 = vpop.eup %4695 }
 0x522   :  { %v1047_v24 = vsel %vm359_vm5, %v4696_v23, 0.0 }
 0x525   :  { %1042 = vadd.xlane.f32.xlu0 %v1041_v21 }
 0x529   :  { %1048 = vadd.xlane.f32.xlu0 %v1047_v24 }
 0x532   :  { %1637 = vrot.lane.b32.xlu1 %v5081_v54, %s4820_s17 }
 0x536   :  { %4638 = vrot.lane.b32.xlu1 %v4637_v30, %s4821_s18 }
 0x53f   :  { %1556 = vrot.lane.b32.xlu0 %v5081_v54, %s4819_s16 }
 0x599   :  { %v1040_v33 = vpop.xlane.xlu1 %1039 }
 0x59a   :  { %4697 = vrcp.f32 %v1040_v33 }
 0x5a1   :  { %v1046_v34 = vpop.xlane.xlu1 %1045 }
 0x5a2   :  { %4699 = vrcp.f32 %v1046_v34 }
 0x5a4   :  { %v4698_v35 = vpop.eup %4697 }
 0x5a5   :  { %v1062_v36 = vmul.f32 %v4698_v35, %v4682_v56 }
 0x5a7   :  { %4325 = vmatmul.mubr.msk.f32.vlgmr.msra.gmra.mrb[16].mxu1 %vm359_vm5, %v1062_v36 }
 0x5a8   :  { %4333 = vmatpush3.msra.mxu1 %v1317_v26  ;;  %4334 = vmatprep.mubr.msk.f32.mxu1 %vm4809_vm4, %v4808_v22 }
 0x5a9   :  { %v1052_v38 = vpop.xlane.xlu1 %1051  ;;  %4342 = vmatprep.subr.mxu1 %v4808_v22 }
 0x5aa   :  { %4701 = vrcp.f32 %v1052_v38  ;;  %v1055_v54 = vpop.xlane.xlu0 %1054 }
 0x5ac   :  { %v4700_v39 = vpop.eup %4699 }
 0x5ad   :  { %v1066_v40 = vmul.f32 %v4700_v39, %v4684_v5 }
 0x5ae   :  { %v1037_v41 = vpop.xlane.xlu0 %1036  ;;  %v1058_v42 = vpop.xlane.xlu1 %1057 }
 0x5af   :  { %4703 = vrcp.f32 %v1037_v41  ;;  %4335 = vmatmul.mubr.msk.f32.vlgmr.msra.gmra.mrb[18].mxu1 %vm359_vm5, %v1066_v40 }
 0x5b0   :  { %4705 = vrcp.f32 %v1058_v42  ;;  %4343 = vmatpush3.msra.mxu1 %v1476_v31  ;;  %4344 = vmatprep.mubr.msk.f32.mxu1 %vm4809_vm4, %v4808_v22  ;;  %v4032_v31 = vld [vmem:[%s5588_s4 + $0x3] ss:$0 sm:$0xff] }
 0x5b1   :  { %4352 = vmatprep.subr.mxu1 %v4808_v22 }
 0x5b2   :  { %v1043_v43 = vpop.xlane.xlu0 %1042  ;;  %v1638_v48 = vpop.permute.xlu1 %1637 }
 0x5b3   :  { %4707 = vrcp.f32 %v1043_v43 }
 0x5b4   :  { %v4702_v44 = vpop.eup %4701 }
 0x5b5   :  { %v1070_v45 = vmul.f32 %v4702_v44, %v4686_v12 }
 0x5b6   :  { %v1049_v46 = vpop.xlane.xlu0 %1048  ;;  %v4639_v2 = vpop.permute.xlu1 %4638 }
 0x5b7   :  { %4709 = vrcp.f32 %v1049_v46  ;;  %4345 = vmatmul.mubr.msk.f32.vlgmr.msra.gmra.mrb[20].mxu1 %vm359_vm5, %v1070_v45  ;;  %v4641_v3 = vunpack.i.h.bf16 %v4639_v2  ;;  %v4640_v4 = vunpack.i.l.bf16 %v4639_v2  ;;  %v4035_v2 = vld [vmem:[%s5588_s4 + $0x4] ss:$0 sm:$0xff] }
 0x5b8   :  { %4353 = vmatpush3.msra.mxu1 %v1638_v48  ;;  %4354 = vmatprep.mubr.msk.f32.mxu1 %vm4809_vm4, %v4808_v22  ;;  %4711 = vrcp.f32 %v1055_v54 }
 0x5b9   :  { %v4704_v50 = vpop.eup %4703  ;;  %v4554_v5 = vpack.c.bf16 %v4641_v3, %v4640_v4  ;;  %v4036_v4 = vld [vmem:[%s5588_s4 + $0x5] ss:$0 sm:$0xff] }
 0x5ba   :  { %v4706_v51 = vpop.eup %4705  ;;  %v1060_v52 = vmul.f32 %v4704_v50, %v4690_v15  ;;  %v1557_v60 = vpop.permute.xlu0 %1556  ;;  %v4642_v15 = vpack.i.bf16 %v5041_v32, %v5032_v29 }
 0x5bb   :  { %v1074_v55 = vmul.f32 %v4706_v51, %v4692_v17  ;;  %4555 = vmatprep.subr.bf16.mxu1 %v4554_v5  ;;  %v265_v51 = vld [vmem:[%s5587_s3 + $0x18] sm:$0xff] }
 0x5bc   :  { %4320 = vmatmul.mubr.msk.f32.vlgmr.msra.gmra.mrb[4].mxu0 %vm359_vm5, %v1060_v52 }
 0x5bd   :  { %v4708_v56 = vpop.eup %4707  ;;  %4328 = vmatpush3.msra.mxu0 %v1235_v25  ;;  %4355 = vmatmul.mubr.msk.f32.vlgmr.msra.gmra.mrb[22].mxu1 %vm359_vm5, %v1074_v55  ;;  %v267_v55 = vld [vmem:[%s5587_s3 + $0x28] sm:$0xff] }
 0x5be   :  { %v1064_v57 = vmul.f32 %v4708_v56, %v4694_v20  ;;  %4329 = vmatprep.mubr.msk.f32.mxu0 %vm4809_vm4, %v4808_v22  ;;  %4337 = vmatprep.subr.mxu0 %v4808_v22  ;;  %v269_v56 = vld [vmem:[%s5587_s3 + $0x38] sm:$0xff] }
 0x5bf   :  { %4557 = vmatpush3.bf16.msra.mxu1 %v4554_v5 }
 0x5c0   :  { %4330 = vmatmul.mubr.msk.f32.vlgmr.msra.gmra.mrb[6].mxu0 %vm359_vm5, %v1064_v57  ;;  %v4566_v57 = vpack.c.bf16 %v269_v56, %v267_v55 }
 0x5c1   :  { %v4710_v58 = vpop.eup %4709  ;;  %4338 = vmatpush3.msra.mxu0 %v1399_v37  ;;  %4339 = vmatprep.mubr.msk.f32.mxu0 %vm4809_vm4, %v4808_v22 }
 0x5c2   :  { %v1068_v59 = vmul.f32 %v4710_v58, %v4696_v23  ;;  %4347 = vmatprep.subr.mxu0 %v4808_v22  ;;  %v4712_v53 = vpop.eup %4711 }
 0x5c3   :  { %v1072_v61 = vmul.f32 %v4712_v53, %v5177_v13 }
 0x5c4   :  { %4340 = vmatmul.mubr.msk.f32.vlgmr.msra.gmra.mrb[8].mxu0 %vm359_vm5, %v1068_v59  ;;  %v4652_v59 = vpack.i.bf16 %v269_v56, %v267_v55  ;;  %v5301_v56 = vld [vmem:[%s5587_s3 + $0x40] sm:$0xff] }
 0x5c5   :  { %4348 = vmatpush3.msra.mxu0 %v1557_v60  ;;  %4349 = vmatprep.mubr.msk.f32.mxu0 %vm4809_vm4, %v4808_v22 }
 0x5c8   :  { %4350 = vmatmul.mubr.msk.f32.vlgmr.msra.gmra.mrb[10].mxu0 %vm359_vm5, %v1072_v61 }
 0x67a   :  { %v1224_v62 = vpop.f32.mrb[16].mxu1 }
 0x67b   :  { %v4326_v63 = vpop.f32.mrb[17].mxu1  ;;  %1229 = vrot.lane.b32.xlu0 %v1224_v62, %s4822_s1 }
 0x682   :  { %v1388_v0 = vpop.f32.mrb[18].mxu1 }
 0x683   :  { %v4336_v1 = vpop.f32.mrb[19].mxu1  ;;  %1393 = vrot.lane.b32.xlu0 %v1388_v0, %s4823_s19 }
 0x68a   :  { %v1547_v6 = vpop.f32.mrb[20].mxu1 }
 0x68b   :  { %v4346_v7 = vpop.f32.mrb[21].mxu1  ;;  %1552 = vrot.lane.b32.xlu0 %v1547_v6, %s4822_s1 }
 0x68f   :  { %v1147_v27 = vpop.f32.mrb[4].mxu0 }
 0x690   :  { %1151 = vst.msk [vmem:[#allocation2] sm:$0xff] %vm359_vm5, %v1147_v27  ;;  %v4321_v28 = vpop.f32.mrb[5].mxu0  ;;  %v1709_v30 = vpop.f32.mrb[22].mxu1 }
 0x691   :  { %v4356_v8 = vpop.f32.mrb[23].mxu1  ;;  %1714 = vrot.lane.b32.xlu0 %v1709_v30, %s4823_s19 }
 0x693   :  { %v1306_v9 = vpop.f32.mrb[6].mxu0 }
 0x694   :  { %1311 = vrot.lane.b32.xlu1 %v1306_v9, %s4824_s2  ;;  %v4331_v10 = vpop.f32.mrb[7].mxu0 }
 0x697   :  { %v1470_v11 = vpop.f32.mrb[8].mxu0 }
 0x698   :  { %1474 = vst.msk [vmem:[#allocation2 + $0x8] sm:$0xff] %vm359_vm5, %v1470_v11  ;;  %v4341_v12 = vpop.f32.mrb[9].mxu0 }
 0x69b   :  { %v1628_v13 = vpop.f32.mrb[10].mxu0 }
 0x69c   :  { %1633 = vrot.lane.b32.xlu1 %v1628_v13, %s4824_s2  ;;  %v4351_v14 = vpop.f32.mrb[11].mxu0 }
 0x6a0   :  { %4643 = vrot.lane.b32.xlu1 %v4642_v15, %s4821_s18 }
 0x6ed   :  { %v1230_v16 = vpop.permute.xlu0 %1229 }
 0x6ee   :  { %1233 = vst.msk [vmem:[#allocation2] sm:$0xff] %vm1232_vm7, %v1230_v16 }
 0x6f5   :  { %v1394_v17 = vpop.permute.xlu0 %1393 }
 0x6fd   :  { %v1553_v18 = vpop.permute.xlu0 %1552 }
 0x6fe   :  { %1555 = vst.msk [vmem:[#allocation2 + $0x8] sm:$0xff] %vm1232_vm7, %v1553_v18 }
 0x703   :  { %v1715_v21 = vpop.permute.xlu0 %1714 }
 0x706   :  { %v1312_v19 = vpop.permute.xlu1 %1311 }
 0x707   :  { %1315 = vst.msk [vmem:[#allocation2] sm:$0xff] %vm1314_vm9, %v1312_v19 }
 0x708   :  { %1397 = vst.msk [vmem:[#allocation2] sm:$0xff] %vm1396_vm13, %v1394_v17  ;;  %v4037_v17 = vld [vmem:[%s5588_s4 + $0x6] ss:$0 sm:$0xff] }
 0x70e   :  { %v1634_v20 = vpop.permute.xlu1 %1633 }
 0x70f   :  { %1636 = vst.msk [vmem:[#allocation2 + $0x8] sm:$0xff] %vm1314_vm9, %v1634_v20  ;;  %v1718_v29 = vld [vmem:[#allocation2] sm:$0xff] }
 0x710   :  { %1717 = vst.msk [vmem:[#allocation2 + $0x8] sm:$0xff] %vm1396_vm13, %v1715_v21  ;;  %4365 = vmatprep.mubr.msk.f32.mxu1 %vm222_vm2, %v1718_v29 }
 0x712   :  { %v4644_v32 = vpop.permute.xlu1 %4643 }
 0x713   :  { %v4646_v23 = vunpack.i.h.bf16 %v4644_v32  ;;  %v4645_v24 = vunpack.i.l.bf16 %v4644_v32 }
 0x715   :  { %v4558_v25 = vpack.c.bf16 %v4646_v23, %v4645_v24 }
 0x717   :  { %4559 = vmatprep.subr.bf16.mxu1 %v4558_v25  ;;  %v1719_v26 = vld [vmem:[#allocation2 + $0x8] sm:$0xff] }
 0x718   :  { %4561 = vmatpush3.bf16.msra.mxu1 %v4558_v25 }
 0x71b   :  { %4366 = vmatmul.mubr.msk.f32.vlgmr.msra.gmra.mrb[24].mxu1 %vm222_vm2, %v1719_v26 }
 0x7ee   :  { %v4367_v33 = vpop.f32.mrb[24].mxu1 }
 0x7ef   :  { %v1819_v34 = vadd.f32 %v4367_v33, %v4032_v31  ;;  %v1813_v35 = vpop.f32.mrb[25].mxu1 }
 0x7f0   :  { %v1814_v36 = vadd.f32 %v4032_v31, %v1813_v35 }
 0x7f1   :  { %v1823_v37 = vadd.f32 %v1819_v34, %v5056_v49 }
 0x7f2   :  { %v1822_v38 = vadd.f32 %v1814_v36, %v5052_v47  ;;  %v263_v47 = vld [vmem:[%s5587_s3 + $0x8] sm:$0xff]  ;;  %v4040_v36 = vld [vmem:[%s5588_s4 + $0x7] ss:$0 sm:$0xff] }
 0x7f3   :  { %v1829_v54 = vsel %vm222_vm2, %v1823_v37, 0.0  ;;  %v4562_v52 = vpack.c.bf16 %v265_v51, %v263_v47  ;;  %v4647_v58 = vpack.i.bf16 %v265_v51, %v263_v47 }
 0x7f4   :  { %1830 = vadd.xlane.f32.xlu1 %v1829_v54  ;;  %v1826_v39 = vsel %vm222_vm2, %v1822_v38, 0.0 }
 0x7f5   :  { %1827 = vadd.xlane.f32.xlu0 %v1826_v39  ;;  %4563 = vmatprep.subr.bf16.mxu1 %v4562_v52 }
 0x7f6   :  { %4565 = vmatpush3.bf16.msra.mxu1 %v4562_v52 }
 0x7f7   :  { %4567 = vmatprep.subr.bf16.mxu1 %v4566_v57 }
 0x7fa   :  { %4569 = vmatpush3.bf16.msra.mxu1 %v4566_v57  ;;  %v5306_v57 = vld [vmem:[%s5587_s3 + $0x50] sm:$0xff] }
 0x805   :  { %4653 = vrot.lane.b32.xlu1 %v4652_v59, %s4818_s15  ;;  %v4657_v59 = vpack.i.bf16 %v5306_v57, %v5301_v56 }
 0x881   :  { %v1831_v40 = vpop.xlane.xlu1 %1830 }
 0x882   :  { %v1833_v41 = vmul.f32 0.03125, %v1831_v40  ;;  %v1828_v42 = vpop.xlane.xlu0 %1827 }
 0x883   :  { %v1832_v43 = vmul.f32 0.03125, %v1828_v42 }
 0x884   :  { %v1835_v44 = vsub.f32 %v1823_v37, %v1833_v41 }
 0x885   :  { %v1834_v45 = vsub.f32 %v1822_v38, %v1832_v43  ;;  %v4654_v13 = vpop.permute.xlu1 %4653 }
 0x886   :  { %v1837_v50 = vmul.f32 %v1835_v44, %v1835_v44  ;;  %v4656_v14 = vunpack.i.h.bf16 %v4654_v13  ;;  %v4655_v15 = vunpack.i.l.bf16 %v4654_v13  ;;  %v4057_v13 = vld [vmem:[%s5588_s4 + $0xa] ss:$0 sm:$0xff] }
 0x887   :  { %v1836_v46 = vmul.f32 %v1834_v45, %v1834_v45 }
 0x888   :  { %v1841_v49 = vsel %vm222_vm2, %v1837_v50, 0.0  ;;  %v4576_v16 = vpack.c.bf16 %v4656_v14, %v4655_v15 }
 0x889   :  { %v1838_v48 = vsel %vm222_vm2, %v1836_v46, 0.0 }
 0x88a   :  { %1839 = vadd.xlane.f32.xlu0 %v1838_v48 }
 0x88e   :  { %1842 = vadd.xlane.f32.xlu0 %v1841_v49 }
 0x8a4   :  { %4648 = vrot.lane.b32.xlu0 %v4647_v58, %s4818_s15  ;;  %v4582_v58 = vpack.c.bf16 %v5306_v57, %v5301_v56 }
 0x8a6   :  { %4583 = vmatprep.subr.bf16.mxu1 %v4582_v58 }
 0x917   :  { %v1840_v53 = vpop.xlane.xlu0 %1839 }
 0x918   :  { %v1844_v60 = vmul.f32 0.03125, %v1840_v53  ;;  %v5315_v53 = vld [vmem:[%s5587_s3 + $0x60] sm:$0xff] }
 0x91a   :  { %v1846_v61 = vadd.f32 1e-05, %v1844_v60  ;;  %v5320_v60 = vld [vmem:[%s5587_s3 + $0x70] sm:$0xff] }
 0x91b   :  { %v1843_v62 = vpop.xlane.xlu0 %1842 }
 0x91c   :  { %4713 = vrsqrt.f32 %v1846_v61  ;;  %v1845_v63 = vmul.f32 0.03125, %v1843_v62  ;;  %v4662_v61 = vpack.i.bf16 %v5320_v60, %v5315_v53  ;;  %v4586_v62 = vpack.c.bf16 %v5320_v60, %v5315_v53 }
 0x91e   :  { %v1847_v0 = vadd.f32 1e-05, %v1845_v63 }
 0x91f   :  { %v4649_v8 = vpop.permute.xlu0 %4648 }
 0x920   :  { %4715 = vrsqrt.f32 %v1847_v0  ;;  %v4651_v9 = vunpack.i.h.bf16 %v4649_v8  ;;  %v4650_v10 = vunpack.i.l.bf16 %v4649_v8 }
 0x922   :  { %v4570_v11 = vpack.c.bf16 %v4651_v9, %v4650_v10 }
 0x924   :  { %4572 = vmatprep.subr.msk.bf16.mxu0 %vm5271_vm15, %v4570_v11 }
 0x925   :  { %4575 = vmatpush3.bf16.xpose.msk.msra.mxu0 %vm5271_vm15, %v4570_v11 }
 0x926   :  { %v4714_v1 = vpop.eup %4713  ;;  %4578 = vmatprep.subr.msk.bf16.mxu0 %vm5271_vm15, %v4576_v16 }
 0x927   :  { %v1850_v3 = vmul.f32 %v4714_v1, %v1834_v45 }
 0x929   :  { %v1856_v5 = vmul.f32 %v4035_v2, %v1850_v3 }
 0x92a   :  { %v4716_v6 = vpop.eup %4715 }
 0x92b   :  { %v1851_v7 = vmul.f32 %v4716_v6, %v1835_v44  ;;  %v1862_v27 = vadd.f32 %v4036_v4, %v1856_v5  ;;  %v4047_v6 = vld [vmem:[%s5588_s4 + $0x8] ss:$0 sm:$0xff] }
 0x92d   :  { %v1857_v28 = vmul.f32 %v4035_v2, %v1851_v7  ;;  %4376 = vmatprep.mubr.msk.f32.mxu1 %vm222_vm2, %v1862_v27  ;;  %4581 = vmatpush3.bf16.xpose.msk.msra.mxu0 %vm5271_vm15, %v4576_v16 }
 0x92e   :  { %4411 = vmatprep.subr.mxu0 %v4808_v22 }
 0x92f   :  { %v1863_v30 = vadd.f32 %v4036_v4, %v1857_v28 }
 0x931   :  { %4377 = vmatmul.mubr.msk.f32.vlgmr.msra.gmra.mrb[26].mxu1 %vm222_vm2, %v1863_v30 }
 0x932   :  { %4585 = vmatpush3.bf16.msra.mxu1 %v4582_v58 }
 0x933   :  { %4587 = vmatprep.subr.bf16.mxu1 %v4586_v62 }
 0x936   :  { %4589 = vmatpush3.bf16.msra.mxu1 %v4586_v62 }
 0x937   :  { %4401 = vmatprep.subr.mxu1 %v4808_v22 }
 0xa04   :  { %v4378_v18 = vpop.f32.mrb[26].mxu1 }
 0xa05   :  { %v1947_v19 = vadd.f32 %v4378_v18, %v4037_v17  ;;  %v1941_v20 = vpop.f32.mrb[27].mxu1 }
 0xa06   :  { %v1942_v21 = vadd.f32 %v4037_v17, %v1941_v20 }
 0xa07   :  { %v1953_v29 = vmul.f32 0.70710677, %v1947_v19  ;;  %v1951_v33 = vmul.f32 0.5, %v1947_v19 }
 0xa08   :  { %v1952_v32 = vmul.f32 0.70710677, %v1942_v21  ;;  %v1950_v26 = vmul.f32 0.5, %v1942_v21 }
 0xa09   :  { %4717 = verf.f32 %v1953_v29 }
 0xa0a   :  { %4719 = verf.f32 %v1952_v32 }
 0xa13   :  { %v4718_v23 = vpop.eup %4717 }
 0xa14   :  { %v4720_v24 = vpop.eup %4719  ;;  %v1957_v25 = vadd.f32 1.0, %v4718_v23 }
 0xa15   :  { %v1956_v31 = vadd.f32 1.0, %v4720_v24 }
 0xa16   :  { %v1959_v35 = vmul.f32 %v1957_v25, %v1951_v33 }
 0xa17   :  { %v1958_v34 = vmul.f32 %v1956_v31, %v1950_v26 }
 0xa19   :  { %4387 = vmatprep.mubr.msk.f32.mxu0 %vm1977_vm14, %v1958_v34 }
 0xa1a   :  { %4388 = vmatmul.mubr.msk.f32.vlgmr.msra.gmra.mrb[12].mxu0 %vm1977_vm14, %v1959_v35 }
 0xa1b   :  { %4413 = vmatprep.mubr.msk.f32.mxu0 %vm4809_vm4, %v4808_v22 }
 0xaed   :  { %v4389_v37 = vpop.f32.mrb[12].mxu0 }
 0xaee   :  { %v2064_v38 = vadd.f32 %v4389_v37, %v4040_v36  ;;  %v2058_v54 = vpop.f32.mrb[13].mxu0 }
 0xaef   :  { %v2059_v39 = vadd.f32 %v4040_v36, %v2058_v54 }
 0xaf0   :  { %v2068_v40 = vadd.f32 %v2064_v38, %v1863_v30  ;;  %v4048_v30 = vld [vmem:[%s5588_s4 + $0x9] ss:$0 sm:$0xff] }
 0xaf1   :  { %v2067_v41 = vadd.f32 %v2059_v39, %v1862_v27 }
 0xaf2   :  { %v2074_v42 = vsel %vm222_vm2, %v2068_v40, 0.0 }
 0xaf3   :  { %2075 = vadd.xlane.f32.xlu0 %v2074_v42  ;;  %v2071_v43 = vsel %vm222_vm2, %v2067_v41, 0.0 }
 0xaf4   :  { %2072 = vadd.xlane.f32.xlu1 %v2071_v43 }
 0xb80   :  { %v2076_v44 = vpop.xlane.xlu0 %2075 }
 0xb81   :  { %v2078_v45 = vmul.f32 0.03125, %v2076_v44  ;;  %v2073_v46 = vpop.xlane.xlu1 %2072 }
 0xb82   :  { %v2077_v48 = vmul.f32 0.03125, %v2073_v46 }
 0xb83   :  { %v2080_v50 = vsub.f32 %v2068_v40, %v2078_v45 }
 0xb84   :  { %v2079_v49 = vsub.f32 %v2067_v41, %v2077_v48 }
 0xb85   :  { %v2082_v47 = vmul.f32 %v2080_v50, %v2080_v50 }
 0xb86   :  { %v2081_v51 = vmul.f32 %v2079_v49, %v2079_v49 }
 0xb87   :  { %v2086_v52 = vsel %vm222_vm2, %v2082_v47, 0.0 }
 0xb88   :  { %2087 = vadd.xlane.f32.xlu1 %v2086_v52  ;;  %v2083_v55 = vsel %vm222_vm2, %v2081_v51, 0.0 }
 0xb89   :  { %2084 = vadd.xlane.f32.xlu0 %v2083_v55 }
 0xc15   :  { %v2088_v63 = vpop.xlane.xlu1 %2087 }
 0xc16   :  { %v2090_v0 = vmul.f32 0.03125, %v2088_v63  ;;  %v2085_v1 = vpop.xlane.xlu0 %2084 }
 0xc17   :  { %v2089_v2 = vmul.f32 0.03125, %v2085_v1 }
 0xc18   :  { %v2092_v3 = vadd.f32 1e-05, %v2090_v0 }
 0xc19   :  { %v2091_v4 = vadd.f32 1e-05, %v2089_v2 }
 0xc1a   :  { %4721 = vrsqrt.f32 %v2092_v3 }
 0xc1b   :  { %4723 = vrsqrt.f32 %v2091_v4 }
 0xc24   :  { %v4722_v5 = vpop.eup %4721 }
 0xc25   :  { %v4724_v7 = vpop.eup %4723  ;;  %v2096_v27 = vmul.f32 %v4722_v5, %v2080_v50 }
 0xc26   :  { %v2095_v28 = vmul.f32 %v4724_v7, %v2079_v49 }
 0xc27   :  { %v2102_v8 = vmul.f32 %v4047_v6, %v2096_v27 }
 0xc28   :  { %v2101_v9 = vmul.f32 %v4047_v6, %v2095_v28 }
 0xc29   :  { %v5335_v11 = vadd.f32 %v4048_v30, %v2102_v8 }
 0xc2a   :  { %v5333_v10 = vadd.f32 %v4048_v30, %v2101_v9 }
 0xc2c   :  { %4398 = vmatprep.mubr.msk.f32.mxu1 %vm222_vm2, %v5333_v10 }
 0xc2d   :  { %4399 = vmatmul.mubr.msk.f32.vlgmr.msra.gmra.mrb[28].mxu1 %vm222_vm2, %v5335_v11 }
 0xc2e   :  { %4403 = vmatprep.mubr.msk.f32.mxu1 %vm4809_vm4, %v4808_v22 }
 0xd00   :  { %v4400_v14 = vpop.f32.mrb[28].mxu1 }
 0xd01   :  { %v5346_v15 = vadd.f32 %v4400_v14, %v4057_v13  ;;  %v2195_v16 = vpop.f32.mrb[29].mxu1 }
 0xd02   :  { %v5348_v17 = vadd.f32 %v4057_v13, %v2195_v16 }
 0xd03   :  { %2520 = vrot.lane.b32.xlu1 %v5346_v15, %s4811_s8 }
 0xd04   :  { %2205 = vrot.lane.b32.xlu0 %v5348_v17, %s4811_s8 }
 0xd07   :  { %2284 = vrot.lane.b32.xlu1 %v5348_v17, %s4810_s7 }
 0xd08   :  { %2599 = vrot.lane.b32.xlu0 %v5346_v15, %s4810_s7 }
 0xd0b   :  { %2282 = vrot.lane.b32.xlu1 %v5348_v17, %s4812_s9 }
 0xd0c   :  { %2442 = vrot.lane.b32.xlu0 %v5348_v17, %s4816_s13 }
 0xd0f   :  { %2363 = vrot.lane.b32.xlu1 %v5348_v17, %s4814_s11 }
 0xd10   :  { %2440 = vrot.lane.b32.xlu0 %v5348_v17, %s4815_s12 }
 0xd13   :  { %2361 = vrot.lane.b32.xlu1 %v5348_v17, %s4813_s10 }
 0xd14   :  { %2678 = vrot.lane.b32.xlu0 %v5346_v15, %s4814_s11 }
 0xd17   :  { %2597 = vrot.lane.b32.xlu1 %v5346_v15, %s4812_s9 }
 0xd18   :  { %2676 = vrot.lane.b32.xlu0 %v5346_v15, %s4813_s10 }
 0xd1b   :  { %2757 = vrot.lane.b32.xlu1 %v5346_v15, %s4816_s13 }
 0xd1f   :  { %2755 = vrot.lane.b32.xlu1 %v5346_v15, %s4815_s12 }
 0xd75   :  { %v2521_v18 = vpop.permute.xlu1 %2520 }
 0xd76   :  { %v2206_v19 = vpop.permute.xlu0 %2205 }
 0xd77   :  { %4402 = vmatpush3.xpose.msk.msra.mxu1 %vm359_vm5, %v2206_v19 }
 0xd78   :  { %4406 = vmatprep.subr.mxu1 %v4808_v22 }
 0xd79   :  { %v2285_v20 = vpop.permute.xlu1 %2284 }
 0xd7a   :  { %4404 = vmatmul.mubr.msk.f32.vlgmr.msra.gmra.mrb[30].mxu1 %vm359_vm5, %v5348_v17  ;;  %v2600_v21 = vpop.permute.xlu0 %2599 }
 0xd7b   :  { %4407 = vmatpush3.xpose.msk.msra.mxu1 %vm359_vm5, %v2285_v20  ;;  %4408 = vmatprep.mubr.msk.f32.mxu1 %vm4809_vm4, %v4808_v22 }
 0xd7c   :  { %4416 = vmatprep.subr.mxu1 %v4808_v22 }
 0xd7d   :  { %v2283_v29 = vpop.permute.xlu1 %2282 }
 0xd7e   :  { %4409 = vmatmul.mubr.msk.f32.vlgmr.msra.gmra.mrb[32].mxu1 %vm359_vm5, %v2283_v29  ;;  %v2443_v32 = vpop.permute.xlu0 %2442 }
 0xd7f   :  { %4417 = vmatpush3.xpose.msk.msra.mxu1 %vm359_vm5, %v2443_v32  ;;  %4418 = vmatprep.mubr.msk.f32.mxu1 %vm4809_vm4, %v4808_v22 }
 0xd80   :  { %4426 = vmatprep.subr.mxu1 %v4808_v22 }
 0xd81   :  { %v2364_v23 = vpop.permute.xlu1 %2363 }
 0xd82   :  { %4412 = vmatpush3.xpose.msk.msra.mxu0 %vm359_vm5, %v2364_v23  ;;  %v2441_v24 = vpop.permute.xlu0 %2440 }
 0xd83   :  { %4419 = vmatmul.mubr.msk.f32.vlgmr.msra.gmra.mrb[34].mxu1 %vm359_vm5, %v2441_v24  ;;  %4421 = vmatprep.subr.mxu0 %v4808_v22 }
 0xd84   :  { %4427 = vmatpush3.xpose.msk.msra.mxu1 %vm359_vm5, %v2600_v21  ;;  %4428 = vmatprep.mubr.msk.f32.mxu1 %vm4809_vm4, %v4808_v22 }
 0xd85   :  { %v2362_v25 = vpop.permute.xlu1 %2361  ;;  %4436 = vmatprep.subr.mxu1 %v4808_v22 }
 0xd86   :  { %4414 = vmatmul.mubr.msk.f32.vlgmr.msra.gmra.mrb[14].mxu0 %vm359_vm5, %v2362_v25  ;;  %v2679_v26 = vpop.permute.xlu0 %2678 }
 0xd87   :  { %4422 = vmatpush3.xpose.msk.msra.mxu0 %vm359_vm5, %v2521_v18  ;;  %4423 = vmatprep.mubr.msk.f32.mxu0 %vm4809_vm4, %v4808_v22 }
 0xd88   :  { %4431 = vmatprep.subr.mxu0 %v4808_v22 }
 0xd89   :  { %v2598_v31 = vpop.permute.xlu1 %2597 }
 0xd8a   :  { %4424 = vmatmul.mubr.msk.f32.vlgmr.msra.gmra.mrb[16].mxu0 %vm359_vm5, %v5346_v15  ;;  %4429 = vmatmul.mubr.msk.f32.vlgmr.msra.gmra.mrb[36].mxu1 %vm359_vm5, %v2598_v31  ;;  %v2677_v33 = vpop.permute.xlu0 %2676 }
 0xd8b   :  { %4432 = vmatpush3.xpose.msk.msra.mxu0 %vm359_vm5, %v2679_v26  ;;  %4433 = vmatprep.mubr.msk.f32.mxu0 %vm4809_vm4, %v4808_v22 }
 0xd8c   :  { %4438 = vmatprep.mubr.msk.f32.mxu1 %vm4809_vm4, %v4808_v22  ;;  %4441 = vmatprep.subr.mxu0 %v4808_v22 }
 0xd8d   :  { %v2758_v34 = vpop.permute.xlu1 %2757 }
 0xd8e   :  { %4434 = vmatmul.mubr.msk.f32.vlgmr.msra.gmra.mrb[18].mxu0 %vm359_vm5, %v2677_v33  ;;  %4437 = vmatpush3.xpose.msk.msra.mxu1 %vm359_vm5, %v2758_v34 }
 0xd8f   :  { %4446 = vmatprep.subr.mxu1 %v4808_v22  ;;  %4443 = vmatprep.mubr.msk.f32.mxu0 %vm4809_vm4, %v4808_v22 }
 0xd91   :  { %v2756_v35 = vpop.permute.xlu1 %2755 }
 0xd92   :  { %4439 = vmatmul.mubr.msk.f32.vlgmr.msra.gmra.mrb[38].mxu1 %vm359_vm5, %v2756_v35 }
 0xd93   :  { %4448 = vmatprep.mubr.msk.f32.mxu1 %vm4809_vm4, %v4808_v22 }
 0xe4d   :  { %v2277_v36 = vpop.f32.mrb[30].mxu1 }
 0xe4e   :  { %v2281_v37 = vmul.f32 0.35355338, %v2277_v36  ;;  %v4405_v38 = vpop.f32.mrb[31].mxu1 }
 0xe50   :  { %v2834_v54 = vsel %vm359_vm5, %v2281_v37, -inf }
 0xe51   :  { %2835 = vmax.xlane.f32.xlu0 %v2834_v54  ;;  %v2356_v39 = vpop.f32.mrb[32].mxu1 }
 0xe52   :  { %v2360_v40 = vmul.f32 0.35355338, %v2356_v39  ;;  %v4410_v41 = vpop.f32.mrb[33].mxu1 }
 0xe54   :  { %v2837_v42 = vsel %vm359_vm5, %v2360_v40, -inf }
 0xe55   :  { %2838 = vmax.xlane.f32.xlu1 %v2837_v42 }
 0xe56   :  { %v2514_v43 = vpop.f32.mrb[34].mxu1 }
 0xe57   :  { %v4420_v44 = vpop.f32.mrb[35].mxu1  ;;  %v2518_v50 = vmul.f32 0.35355338, %v2514_v43 }
 0xe59   :  { %v2435_v45 = vpop.f32.mrb[14].mxu0  ;;  %v2843_v63 = vsel %vm359_vm5, %v2518_v50, -inf }
 0xe5a   :  { %v2439_v46 = vmul.f32 0.35355338, %v2435_v45  ;;  %v4415_v48 = vpop.f32.mrb[15].mxu0 }
 0xe5c   :  { %v2840_v49 = vsel %vm359_vm5, %v2439_v46, -inf }
 0xe5d   :  { %v2592_v47 = vpop.f32.mrb[16].mxu0  ;;  %2841 = vmax.xlane.f32.xlu0 %v2840_v49  ;;  %v2671_v51 = vpop.f32.mrb[36].mxu1 }
 0xe5e   :  { %v2675_v52 = vmul.f32 0.35355338, %v2671_v51  ;;  %v4425_v55 = vpop.f32.mrb[17].mxu0  ;;  %v4430_v58 = vpop.f32.mrb[37].mxu1  ;;  %v2596_v62 = vmul.f32 0.35355338, %v2592_v47 }
 0xe60   :  { %v2849_v0 = vsel %vm359_vm5, %v2675_v52, -inf  ;;  %v2846_v4 = vsel %vm359_vm5, %v2596_v62, -inf }
 0xe61   :  { %2844 = vmax.xlane.f32.xlu0 %v2843_v63  ;;  %2850 = vmax.xlane.f32.xlu1 %v2849_v0  ;;  %v2750_v1 = vpop.f32.mrb[18].mxu0 }
 0xe62   :  { %v4435_v2 = vpop.f32.mrb[19].mxu0  ;;  %v2754_v3 = vmul.f32 0.35355338, %v2750_v1 }
 0xe64   :  { %v2852_v28 = vsel %vm359_vm5, %v2754_v3, -inf }
 0xe65   :  { %2847 = vmax.xlane.f32.xlu0 %v2846_v4  ;;  %v2829_v5 = vpop.f32.mrb[38].mxu1 }
 0xe66   :  { %v2833_v6 = vmul.f32 0.35355338, %v2829_v5  ;;  %v4440_v7 = vpop.f32.mrb[39].mxu1 }
 0xe68   :  { %v2855_v27 = vsel %vm359_vm5, %v2833_v6, -inf }
 0xe69   :  { %2856 = vmax.xlane.f32.xlu1 %v2855_v27  ;;  %2853 = vmax.xlane.f32.xlu0 %v2852_v28 }
 0xe7a   :  { %2999 = vrot.lane.b32.xlu1 %v5348_v17, %s4817_s14 }
 0xe7e   :  { %3080 = vrot.lane.b32.xlu1 %v5348_v17, %s4819_s16 }
 0xe7f   :  { %2922 = vrot.lane.b32.xlu0 %v5348_v17, %s4818_s15 }
 0xe82   :  { %3161 = vrot.lane.b32.xlu1 %v5348_v17, %s4820_s17 }
 0xe83   :  { %3242 = vrot.lane.b32.xlu0 %v5346_v15, %s4818_s15 }
 0xe86   :  { %3319 = vrot.lane.b32.xlu1 %v5346_v15, %s4817_s14 }
 0xede   :  { %v2836_v30 = vpop.xlane.xlu0 %2835 }
 0xedf   :  { %v2858_v8 = vsub.f32 %v2281_v37, %v2836_v30 }
 0xee1   :  { %v2866_v9 = vmul.f32 1.442695, %v2858_v8 }
 0xee2   :  { %v2839_v13 = vpop.xlane.xlu1 %2838 }
 0xee3   :  { %4725 = vpow2.f32 %v2866_v9  ;;  %v2859_v14 = vsub.f32 %v2360_v40, %v2839_v13 }
 0xee5   :  { %v2868_v16 = vmul.f32 1.442695, %v2859_v14 }
 0xee7   :  { %4727 = vpow2.f32 %v2868_v16 }
 0xeea   :  { %v2842_v18 = vpop.xlane.xlu0 %2841 }
 0xeeb   :  { %v2860_v19 = vsub.f32 %v2439_v46, %v2842_v18 }
 0xeed   :  { %v5440_v20 = vpop.eup %4725  ;;  %v2870_v21 = vmul.f32 1.442695, %v2860_v19 }
 0xeee   :  { %v2851_v17 = vpop.xlane.xlu1 %2850  ;;  %v2845_v29 = vpop.xlane.xlu0 %2844  ;;  %v2882_v32 = vsel %vm359_vm5, %v5440_v20, 0.0 }
 0xeef   :  { %4729 = vpow2.f32 %v2870_v21  ;;  %v2863_v23 = vsub.f32 %v2675_v52, %v2851_v17  ;;  %v2861_v24 = vsub.f32 %v2518_v50, %v2845_v29  ;;  %2883 = vadd.xlane.f32.xlu0 %v2882_v32 }
 0xef1   :  { %v4728_v25 = vpop.eup %4727  ;;  %v2872_v26 = vmul.f32 1.442695, %v2861_v24  ;;  %v2876_v31 = vmul.f32 1.442695, %v2863_v23 }
 0xef2   :  { %v2848_v33 = vpop.xlane.xlu0 %2847  ;;  %v2885_v34 = vsel %vm359_vm5, %v4728_v25, 0.0 }
 0xef3   :  { %v2862_v35 = vsub.f32 %v2596_v62, %v2848_v33  ;;  %2886 = vadd.xlane.f32.xlu1 %v2885_v34  ;;  %4731 = vpow2.f32 %v2872_v26 }
 0xef4   :  { %4733 = vpow2.f32 %v2876_v31 }
 0xef5   :  { %v2874_v36 = vmul.f32 1.442695, %v2862_v35 }
 0xef6   :  { %v2857_v37 = vpop.xlane.xlu1 %2856  ;;  %v2854_v38 = vpop.xlane.xlu0 %2853 }
 0xef7   :  { %4735 = vpow2.f32 %v2874_v36  ;;  %v2865_v54 = vsub.f32 %v2833_v6, %v2857_v37  ;;  %v2864_v39 = vsub.f32 %v2754_v3, %v2854_v38 }
 0xef9   :  { %v4730_v40 = vpop.eup %4729  ;;  %v2880_v41 = vmul.f32 1.442695, %v2865_v54  ;;  %v2878_v42 = vmul.f32 1.442695, %v2864_v39 }
 0xefa   :  { %v3000_v43 = vpop.permute.xlu1 %2999  ;;  %v2923_v44 = vpop.permute.xlu0 %2922  ;;  %v2888_v45 = vsel %vm359_vm5, %v4730_v40, 0.0 }
 0xefb   :  { %4737 = vpow2.f32 %v2880_v41  ;;  %4447 = vmatpush3.msra.mxu1 %v3000_v43  ;;  %2889 = vadd.xlane.f32.xlu0 %v2888_v45 }
 0xefc   :  { %4739 = vpow2.f32 %v2878_v42  ;;  %4442 = vmatpush3.msra.mxu0 %v2923_v44  ;;  %4456 = vmatprep.subr.mxu1 %v4808_v22 }
 0xefd   :  { %4451 = vmatprep.subr.mxu0 %v4808_v22  ;;  %v4732_v46 = vpop.eup %4731 }
 0xefe   :  { %v2891_v48 = vsel %vm359_vm5, %v4732_v46, 0.0  ;;  %v4734_v50 = vpop.eup %4733  ;;  %v3081_v63 = vpop.permute.xlu1 %3080 }
 0xeff   :  { %2892 = vadd.xlane.f32.xlu1 %v2891_v48  ;;  %v2897_v51 = vsel %vm359_vm5, %v4734_v50, 0.0  ;;  %v3243_v1 = vpop.permute.xlu0 %3242 }
 0xf01   :  { %v4736_v49 = vpop.eup %4735 }
 0xf02   :  { %v2894_v47 = vsel %vm359_vm5, %v4736_v49, 0.0  ;;  %v3162_v0 = vpop.permute.xlu1 %3161 }
 0xf03   :  { %2895 = vadd.xlane.f32.xlu0 %v2894_v47  ;;  %2898 = vadd.xlane.f32.xlu1 %v2897_v51 }
 0xf05   :  { %v5451_v52 = vpop.eup %4737 }
 0xf06   :  { %v5453_v55 = vpop.eup %4739  ;;  %v2903_v58 = vsel %vm359_vm5, %v5451_v52, 0.0  ;;  %v3320_v2 = vpop.permute.xlu1 %3319 }
 0xf07   :  { %v2900_v62 = vsel %vm359_vm5, %v5453_v55, 0.0  ;;  %2904 = vadd.xlane.f32.xlu1 %v2903_v58 }
 0xf08   :  { %2901 = vadd.xlane.f32.xlu0 %v2900_v62 }
 0xf18   :  { %3481 = vrot.lane.b32.xlu1 %v5346_v15, %s4820_s17 }
 0xf1c   :  { %4658 = vrot.lane.b32.xlu1 %v4657_v59, %s4821_s18 }
 0xf1e   :  { %3400 = vrot.lane.b32.xlu0 %v5346_v15, %s4819_s16 }
 0xf7c   :  { %v2884_v3 = vpop.xlane.xlu0 %2883 }
 0xf7d   :  { %4741 = vrcp.f32 %v2884_v3 }
 0xf80   :  { %v2887_v4 = vpop.xlane.xlu1 %2886 }
 0xf81   :  { %4743 = vrcp.f32 %v2887_v4 }
 0xf87   :  { %v4742_v5 = vpop.eup %4741 }
 0xf88   :  { %v2907_v6 = vmul.f32 %v4742_v5, %v5440_v20  ;;  %v2890_v7 = vpop.xlane.xlu0 %2889 }
 0xf89   :  { %4745 = vrcp.f32 %v2890_v7 }
 0xf8a   :  { %4444 = vmatmul.mubr.msk.f32.vlgmr.msra.gmra.mrb[20].mxu0 %vm359_vm5, %v2907_v6 }
 0xf8b   :  { %v4744_v56 = vpop.eup %4743  ;;  %4452 = vmatpush3.msra.mxu0 %v3081_v63  ;;  %4453 = vmatprep.mubr.msk.f32.mxu0 %vm4809_vm4, %v4808_v22 }
 0xf8c   :  { %v2909_v57 = vmul.f32 %v4744_v56, %v4728_v25  ;;  %4461 = vmatprep.subr.mxu0 %v4808_v22  ;;  %v2893_v59 = vpop.xlane.xlu1 %2892 }
 0xf8d   :  { %4747 = vrcp.f32 %v2893_v59 }
 0xf8e   :  { %4449 = vmatmul.mubr.msk.f32.vlgmr.msra.gmra.mrb[40].mxu1 %vm359_vm5, %v2909_v57 }
 0xf8f   :  { %4457 = vmatpush3.msra.mxu1 %v3162_v0  ;;  %4458 = vmatprep.mubr.msk.f32.mxu1 %vm4809_vm4, %v4808_v22  ;;  %v4084_v0 = vld [vmem:[%s5588_s4 + $0xb] ss:$0 sm:$0xff] }
 0xf90   :  { %v2896_v15 = vpop.xlane.xlu0 %2895  ;;  %4466 = vmatprep.subr.mxu1 %v4808_v22  ;;  %v2899_v27 = vpop.xlane.xlu1 %2898 }
 0xf91   :  { %4749 = vrcp.f32 %v2896_v15 }
 0xf92   :  { %4751 = vrcp.f32 %v2899_v27 }
 0xf93   :  { %v4746_v28 = vpop.eup %4745 }
 0xf94   :  { %v2911_v30 = vmul.f32 %v4746_v28, %v4730_v40  ;;  %v2905_v8 = vpop.xlane.xlu1 %2904 }
 0xf95   :  { %v2902_v9 = vpop.xlane.xlu0 %2901  ;;  %4753 = vrcp.f32 %v2905_v8 }
 0xf96   :  { %4454 = vmatmul.mubr.msk.f32.vlgmr.msra.gmra.mrb[22].mxu0 %vm359_vm5, %v2911_v30  ;;  %4755 = vrcp.f32 %v2902_v9 }
 0xf97   :  { %4462 = vmatpush3.msra.mxu0 %v3243_v1  ;;  %4463 = vmatprep.mubr.msk.f32.mxu0 %vm4809_vm4, %v4808_v22  ;;  %v4748_v13 = vpop.eup %4747 }
 0xf98   :  { %4471 = vmatprep.subr.mxu0 %v4808_v22  ;;  %v2913_v14 = vmul.f32 %v4748_v13, %v4732_v46  ;;  %v3482_v17 = vpop.permute.xlu1 %3481 }
 0xf99   :  { %v3401_v21 = vpop.permute.xlu0 %3400 }
 0xf9a   :  { %4459 = vmatmul.mubr.msk.f32.vlgmr.msra.gmra.mrb[42].mxu1 %vm359_vm5, %v2913_v14  ;;  %v4052_v14 = vld [vmem:[%s5587_s3 + $0x58] sm:$0xff] }
 0xf9b   :  { %v4750_v16 = vpop.eup %4749  ;;  %4467 = vmatpush3.msra.mxu1 %v3320_v2  ;;  %4468 = vmatprep.mubr.msk.f32.mxu1 %vm4809_vm4, %v4808_v22 }
 0xf9c   :  { %v4752_v18 = vpop.eup %4751  ;;  %v2915_v19 = vmul.f32 %v4750_v16, %v4736_v49  ;;  %4476 = vmatprep.subr.mxu1 %v4808_v22  ;;  %v4659_v25 = vpop.permute.xlu1 %4658 }
 0xf9d   :  { %v2917_v20 = vmul.f32 %v4752_v18, %v4734_v50  ;;  %v4661_v26 = vunpack.i.h.bf16 %v4659_v25  ;;  %v4660_v31 = vunpack.i.l.bf16 %v4659_v25  ;;  %v4054_v18 = vld [vmem:[%s5587_s3 + $0x68] sm:$0xff] }
 0xf9e   :  { %4464 = vmatmul.mubr.msk.f32.vlgmr.msra.gmra.mrb[24].mxu0 %vm359_vm5, %v2915_v19  ;;  %v4056_v19 = vld [vmem:[%s5587_s3 + $0x78] sm:$0xff] }
 0xf9f   :  { %4469 = vmatmul.mubr.msk.f32.vlgmr.msra.gmra.mrb[44].mxu1 %vm359_vm5, %v2917_v20  ;;  %4472 = vmatpush3.msra.mxu0 %v3401_v21  ;;  %v4754_v29 = vpop.eup %4753  ;;  %v4590_v33 = vpack.c.bf16 %v4661_v26, %v4660_v31  ;;  %v4672_v21 = vpack.i.bf16 %v4056_v19, %v4054_v18 }
 0xfa0   :  { %4477 = vmatpush3.msra.mxu1 %v3482_v17  ;;  %4473 = vmatprep.mubr.msk.f32.mxu0 %vm4809_vm4, %v4808_v22  ;;  %v4756_v32 = vpop.eup %4755  ;;  %v2921_v23 = vmul.f32 %v4754_v29, %v5451_v52  ;;  %v4602_v17 = vpack.c.bf16 %v4056_v19, %v4054_v18 }
 0xfa1   :  { %4478 = vmatprep.mubr.msk.f32.mxu1 %vm4809_vm4, %v4808_v22  ;;  %v2919_v24 = vmul.f32 %v4756_v32, %v5453_v55  ;;  %4591 = vmatprep.subr.bf16.mxu0 %v4590_v33 }
 0xfa3   :  { %4479 = vmatmul.mubr.msk.f32.vlgmr.msra.gmra.mrb[46].mxu1 %vm359_vm5, %v2921_v23  ;;  %4474 = vmatmul.mubr.msk.f32.vlgmr.msra.gmra.mrb[26].mxu0 %vm359_vm5, %v2919_v24 }
 0xfa4   :  { %4593 = vmatpush3.bf16.msra.mxu0 %v4590_v33  ;;  %v4087_v33 = vld [vmem:[%s5588_s4 + $0xc] ss:$0 sm:$0xff] }
0x105d   :  { %v2994_v34 = vpop.f32.mrb[20].mxu0 }
0x105e   :  { %2998 = vst.msk [vmem:[#allocation2] sm:$0xff] %vm359_vm5, %v2994_v34  ;;  %v4445_v35 = vpop.f32.mrb[21].mxu0 }
0x105f   :  { %v4088_v35 = vld [vmem:[%s5588_s4 + $0xd] ss:$0 sm:$0xff] }
0x1061   :  { %v3071_v36 = vpop.f32.mrb[40].mxu1 }
0x1062   :  { %v4450_v37 = vpop.f32.mrb[41].mxu1  ;;  %3076 = vrot.lane.b32.xlu0 %v3071_v36, %s4822_s1 }
0x1069   :  { %v3152_v22 = vpop.f32.mrb[22].mxu0 }
0x106a   :  { %3157 = vrot.lane.b32.xlu1 %v3152_v22, %s4824_s2  ;;  %v4455_v38 = vpop.f32.mrb[23].mxu0 }
0x106d   :  { %v3233_v54 = vpop.f32.mrb[42].mxu1 }
0x106e   :  { %v4460_v39 = vpop.f32.mrb[43].mxu1  ;;  %3238 = vrot.lane.b32.xlu0 %v3233_v54, %s4823_s19 }
0x1071   :  { %v3314_v40 = vpop.f32.mrb[24].mxu0 }
0x1072   :  { %3318 = vst.msk [vmem:[#allocation2 + $0x8] sm:$0xff] %vm359_vm5, %v3314_v40  ;;  %v3391_v41 = vpop.f32.mrb[44].mxu1  ;;  %v4465_v42 = vpop.f32.mrb[25].mxu0 }
0x1073   :  { %v4470_v43 = vpop.f32.mrb[45].mxu1  ;;  %3396 = vrot.lane.b32.xlu0 %v3391_v41, %s4822_s1 }
0x1076   :  { %v3553_v44 = vpop.f32.mrb[46].mxu1  ;;  %v3472_v45 = vpop.f32.mrb[26].mxu0 }
0x1077   :  { %v4480_v46 = vpop.f32.mrb[47].mxu1  ;;  %3558 = vrot.lane.b32.xlu0 %v3553_v44, %s4823_s19  ;;  %3477 = vrot.lane.b32.xlu1 %v3472_v45, %s4824_s2  ;;  %v4475_v48 = vpop.f32.mrb[27].mxu0 }
0x107b   :  { %4663 = vrot.lane.b32.xlu1 %v4662_v61, %s4821_s18 }
0x10d4   :  { %v3077_v50 = vpop.permute.xlu0 %3076 }
0x10d5   :  { %3079 = vst.msk [vmem:[#allocation2] sm:$0xff] %vm1232_vm7, %v3077_v50  ;;  %v4089_v50 = vld [vmem:[%s5588_s4 + $0xe] ss:$0 sm:$0xff] }
0x10dc   :  { %v3158_v49 = vpop.permute.xlu1 %3157 }
0x10dd   :  { %3160 = vst.msk [vmem:[#allocation2] sm:$0xff] %vm1314_vm9, %v3158_v49 }
0x10e0   :  { %v3239_v47 = vpop.permute.xlu0 %3238 }
0x10e1   :  { %3241 = vst.msk [vmem:[#allocation2] sm:$0xff] %vm1396_vm13, %v3239_v47 }
0x10e5   :  { %v3397_v51 = vpop.permute.xlu0 %3396 }
0x10e6   :  { %3399 = vst.msk [vmem:[#allocation2 + $0x8] sm:$0xff] %vm1232_vm7, %v3397_v51 }
0x10e8   :  { %v3562_v55 = vld [vmem:[#allocation2] sm:$0xff] }
0x10e9   :  { %v3559_v52 = vpop.permute.xlu0 %3558  ;;  %v3478_v58 = vpop.permute.xlu1 %3477  ;;  %4489 = vmatprep.mubr.msk.f32.mxu0 %vm222_vm2, %v3562_v55 }
0x10ea   :  { %3480 = vst.msk [vmem:[#allocation2 + $0x8] sm:$0xff] %vm1314_vm9, %v3478_v58 }
0x10eb   :  { %3561 = vst.msk [vmem:[#allocation2 + $0x8] sm:$0xff] %vm1396_vm13, %v3559_v52 }
0x10ed   :  { %v4664_v53 = vpop.permute.xlu1 %4663 }
0x10ee   :  { %v4666_v60 = vunpack.i.h.bf16 %v4664_v53  ;;  %v4665_v61 = vunpack.i.l.bf16 %v4664_v53 }
0x10f0   :  { %v4594_v62 = vpack.c.bf16 %v4666_v60, %v4665_v61 }
0x10f2   :  { %4595 = vmatprep.subr.bf16.mxu0 %v4594_v62  ;;  %v3563_v63 = vld [vmem:[#allocation2 + $0x8] sm:$0xff] }
0x10f3   :  { %4597 = vmatpush3.bf16.msra.mxu0 %v4594_v62 }
0x10f6   :  { %4490 = vmatmul.mubr.msk.f32.vlgmr.msra.gmra.mrb[28].mxu0 %vm222_vm2, %v3563_v63 }
0x11c9   :  { %v4491_v1 = vpop.f32.mrb[28].mxu0 }
0x11ca   :  { %v3663_v2 = vadd.f32 %v4491_v1, %v4084_v0  ;;  %v3657_v3 = vpop.f32.mrb[29].mxu0 }
0x11cb   :  { %v3658_v4 = vadd.f32 %v4084_v0, %v3657_v3 }
0x11cc   :  { %v3667_v5 = vadd.f32 %v3663_v2, %v5335_v11  ;;  %v4092_v2 = vld [vmem:[%s5588_s4 + $0xf] ss:$0 sm:$0xff] }
0x11cd   :  { %v3666_v6 = vadd.f32 %v3658_v4, %v5333_v10  ;;  %v4050_v10 = vld [vmem:[%s5587_s3 + $0x48] sm:$0xff] }
0x11ce   :  { %v3673_v7 = vsel %vm222_vm2, %v3667_v5, 0.0  ;;  %v4598_v16 = vpack.c.bf16 %v4052_v14, %v4050_v10  ;;  %v4667_v20 = vpack.i.bf16 %v4052_v14, %v4050_v10 }
0x11cf   :  { %3674 = vadd.xlane.f32.xlu1 %v3673_v7  ;;  %v3670_v56 = vsel %vm222_vm2, %v3666_v6, 0.0 }
0x11d0   :  { %3671 = vadd.xlane.f32.xlu0 %v3670_v56  ;;  %4599 = vmatprep.subr.bf16.mxu1 %v4598_v16 }
0x11d1   :  { %4601 = vmatpush3.bf16.msra.mxu1 %v4598_v16 }
0x11d2   :  { %4603 = vmatprep.subr.bf16.mxu1 %v4602_v17 }
0x11d5   :  { %4605 = vmatpush3.bf16.msra.mxu1 %v4602_v17 }
0x11e0   :  { %4673 = vrot.lane.b32.xlu1 %v4672_v21, %s4818_s15 }
0x125c   :  { %v3675_v57 = vpop.xlane.xlu1 %3674 }
0x125d   :  { %v3677_v59 = vmul.f32 0.03125, %v3675_v57  ;;  %v3672_v15 = vpop.xlane.xlu0 %3671 }
0x125e   :  { %v3676_v27 = vmul.f32 0.03125, %v3672_v15 }
0x125f   :  { %v3679_v28 = vsub.f32 %v3667_v5, %v3677_v59 }
0x1260   :  { %v3678_v30 = vsub.f32 %v3666_v6, %v3676_v27  ;;  %v4674_v44 = vpop.permute.xlu1 %4673 }
0x1261   :  { %v3681_v13 = vmul.f32 %v3679_v28, %v3679_v28  ;;  %v4676_v45 = vunpack.i.h.bf16 %v4674_v44  ;;  %v4675_v46 = vunpack.i.l.bf16 %v4674_v44 }
0x1262   :  { %v3680_v8 = vmul.f32 %v3678_v30, %v3678_v30 }
0x1263   :  { %v3685_v11 = vsel %vm222_vm2, %v3681_v13, 0.0  ;;  %v4612_v48 = vpack.c.bf16 %v4676_v45, %v4675_v46 }
0x1264   :  { %v3682_v9 = vsel %vm222_vm2, %v3680_v8, 0.0 }
0x1265   :  { %3683 = vadd.xlane.f32.xlu0 %v3682_v9 }
0x1269   :  { %3686 = vadd.xlane.f32.xlu0 %v3685_v11 }
0x127f   :  { %4668 = vrot.lane.b32.xlu0 %v4667_v20, %s4818_s15 }
0x12f2   :  { %v3684_v29 = vpop.xlane.xlu0 %3683 }
0x12f3   :  { %v3688_v32 = vmul.f32 0.03125, %v3684_v29 }
0x12f5   :  { %v3690_v23 = vadd.f32 1e-05, %v3688_v32  ;;  %v4099_v32 = vld [vmem:[%s5588_s4 + $0x10] ss:$0 sm:$0xff] }
0x12f6   :  { %v3687_v24 = vpop.xlane.xlu0 %3686 }
0x12f7   :  { %4757 = vrsqrt.f32 %v3690_v23  ;;  %v3689_v25 = vmul.f32 0.03125, %v3687_v24 }
0x12f9   :  { %v3691_v26 = vadd.f32 1e-05, %v3689_v25  ;;  %v4100_v25 = vld [vmem:[%s5588_s4 + $0x11] ss:$0 sm:$0xff] }
0x12fa   :  { %v4669_v40 = vpop.permute.xlu0 %4668 }
0x12fb   :  { %4759 = vrsqrt.f32 %v3691_v26  ;;  %v4671_v41 = vunpack.i.h.bf16 %v4669_v40  ;;  %v4670_v42 = vunpack.i.l.bf16 %v4669_v40 }
0x12fd   :  { %v4606_v43 = vpack.c.bf16 %v4671_v41, %v4670_v42 }
0x12ff   :  { %4608 = vmatprep.subr.msk.bf16.mxu0 %vm5271_vm15, %v4606_v43 }
0x1300   :  { %4611 = vmatpush3.bf16.xpose.msk.msra.mxu0 %vm5271_vm15, %v4606_v43 }
0x1301   :  { %v4758_v31 = vpop.eup %4757  ;;  %4614 = vmatprep.subr.msk.bf16.mxu0 %vm5271_vm15, %v4612_v48 }
0x1302   :  { %v3694_v34 = vmul.f32 %v4758_v31, %v3678_v30 }
0x1304   :  { %v3700_v36 = vmul.f32 %v4087_v33, %v3694_v34 }
0x1305   :  { %v4760_v37 = vpop.eup %4759 }
0x1306   :  { %v3695_v22 = vmul.f32 %v4760_v37, %v3679_v28  ;;  %v3706_v38 = vadd.f32 %v4088_v35, %v3700_v36 }
0x1308   :  { %v3701_v54 = vmul.f32 %v4087_v33, %v3695_v22  ;;  %4500 = vmatprep.mubr.msk.f32.mxu1 %vm222_vm2, %v3706_v38  ;;  %4617 = vmatpush3.bf16.xpose.msk.msra.mxu0 %vm5271_vm15, %v4612_v48 }
0x130a   :  { %v3707_v39 = vadd.f32 %v4088_v35, %v3701_v54 }
0x130c   :  { %4501 = vmatmul.mubr.msk.f32.vlgmr.msra.gmra.mrb[48].mxu1 %vm222_vm2, %v3707_v39 }
0x13df   :  { %v4502_v49 = vpop.f32.mrb[48].mxu1 }
0x13e0   :  { %v3791_v47 = vadd.f32 %v4502_v49, %v4089_v50  ;;  %v3785_v51 = vpop.f32.mrb[49].mxu1 }
0x13e1   :  { %v3786_v52 = vadd.f32 %v4089_v50, %v3785_v51 }
0x13e2   :  { %v3797_v55 = vmul.f32 0.70710677, %v3791_v47  ;;  %v3795_v0 = vmul.f32 0.5, %v3791_v47 }
0x13e3   :  { %v3796_v58 = vmul.f32 0.70710677, %v3786_v52  ;;  %v3794_v62 = vmul.f32 0.5, %v3786_v52 }
0x13e4   :  { %4761 = verf.f32 %v3797_v55 }
0x13e5   :  { %4763 = verf.f32 %v3796_v58 }
0x13ee   :  { %v4762_v53 = vpop.eup %4761 }
0x13ef   :  { %v4764_v60 = vpop.eup %4763  ;;  %v3801_v61 = vadd.f32 1.0, %v4762_v53 }
0x13f0   :  { %v3800_v63 = vadd.f32 1.0, %v4764_v60 }
0x13f1   :  { %v3803_v1 = vmul.f32 %v3801_v61, %v3795_v0 }
0x13f2   :  { %v3802_v12 = vmul.f32 %v3800_v63, %v3794_v62 }
0x13f4   :  { %4511 = vmatprep.mubr.msk.f32.mxu0 %vm1977_vm14, %v3802_v12 }
0x13f5   :  { %4512 = vmatmul.mubr.msk.f32.vlgmr.msra.gmra.mrb[30].mxu0 %vm1977_vm14, %v3803_v1 }
0x14c8   :  { %v4513_v3 = vpop.f32.mrb[30].mxu0 }
0x14c9   :  { %v3907_v4 = vadd.f32 %v4513_v3, %v4092_v2  ;;  %v3901_v5 = vpop.f32.mrb[31].mxu0 }
0x14ca   :  { %v3902_v6 = vadd.f32 %v4092_v2, %v3901_v5 }
0x14cb   :  { %v3911_v7 = vadd.f32 %v3907_v4, %v3707_v39 }
0x14cc   :  { %v3910_v56 = vadd.f32 %v3902_v6, %v3706_v38 }
0x14cd   :  { %v3917_v57 = vsel %vm222_vm2, %v3911_v7, 0.0 }
0x14ce   :  { %3918 = vadd.xlane.f32.xlu1 %v3917_v57  ;;  %v3914_v59 = vsel %vm222_vm2, %v3910_v56, 0.0 }
0x14cf   :  { %3915 = vadd.xlane.f32.xlu0 %v3914_v59 }
0x155b   :  { %v3919_v15 = vpop.xlane.xlu1 %3918 }
0x155c   :  { %v3921_v27 = vmul.f32 0.03125, %v3919_v15  ;;  %v3916_v28 = vpop.xlane.xlu0 %3915 }
0x155d   :  { %v3920_v30 = vmul.f32 0.03125, %v3916_v28 }
0x155e   :  { %v3923_v8 = vsub.f32 %v3911_v7, %v3921_v27 }
0x155f   :  { %v3922_v9 = vsub.f32 %v3910_v56, %v3920_v30 }
0x1560   :  { %v3925_v13 = vmul.f32 %v3923_v8, %v3923_v8 }
0x1561   :  { %v3924_v11 = vmul.f32 %v3922_v9, %v3922_v9 }
0x1562   :  { %v3929_v10 = vsel %vm222_vm2, %v3925_v13, 0.0 }
0x1563   :  { %3930 = vadd.xlane.f32.xlu0 %v3929_v10  ;;  %v3926_v14 = vsel %vm222_vm2, %v3924_v11, 0.0 }
0x1564   :  { %3927 = vadd.xlane.f32.xlu1 %v3926_v14 }
0x15f0   :  { %v3931_v16 = vpop.xlane.xlu0 %3930 }
0x15f1   :  { %v3933_v18 = vmul.f32 0.03125, %v3931_v16  ;;  %v3928_v19 = vpop.xlane.xlu1 %3927 }
0x15f2   :  { %v3932_v20 = vmul.f32 0.03125, %v3928_v19 }
0x15f3   :  { %v3935_v21 = vadd.f32 1e-05, %v3933_v18 }
0x15f4   :  { %v3934_v17 = vadd.f32 1e-05, %v3932_v20 }
0x15f5   :  { %4765 = vrsqrt.f32 %v3935_v21 }
0x15f6   :  { %4767 = vrsqrt.f32 %v3934_v17 }
0x15ff   :  { %v4766_v29 = vpop.eup %4765 }
0x1600   :  { %v4768_v23 = vpop.eup %4767  ;;  %v3939_v24 = vmul.f32 %v4766_v29, %v3923_v8 }
0x1601   :  { %v3938_v26 = vmul.f32 %v4768_v23, %v3922_v9 }
0x1602   :  { %v3945_v31 = vmul.f32 %v4099_v32, %v3939_v24 }
0x1603   :  { %v3944_v33 = vmul.f32 %v4099_v32, %v3938_v26 }
0x1604   :  { %v3951_v34 = vadd.f32 %v4100_v25, %v3945_v31 }
0x1605   :  { %v3950_v35 = vadd.f32 %v4100_v25, %v3944_v33 }
0x1606   :  { %v3953_v36 = vrot.slane %v3951_v34, 7 }
0x1608   :  { %v3955_v37 = vsel %vm107_vm0, %v3950_v35, %v3953_v36 }
0x1609   :  { %3957 = vst.msk [vmem:[#allocation5] sm:$0x3] %vm3956_vm3, %v3955_v37 }
0x160a   :  { %4792 = shalt.err (!%p4789_p9)
}
0x160b   :  { %s4793_s23 = scalar_lea.hbm %s5589_s5, 32 }
0x160c   :  { %p4794_p10 = scmp.ne.s32.totalorder %s5589_s5, %s4793_s23  ;;  %p4797_p11 = scmp.lt.u32.totalorder %s4793_s23, %s5589_s5 }
0x160e   :  { %p4799_p12 = pnand %p4797_p11, %p4794_p10 }
0x1610   :  { %4802 = shalt.err (!%p4799_p12)
}
0x1611   :  { %3967 = dma.vmem_to_hbm [thread:$0]  %s3965_s20, 32, %s5589_s5, [#allocation6]  }
0x1612   :  { %4805 = dma.done.wait [#allocation6], 32  }
0x1613   :  { %4806 = vsyncadd [#allocation6], 4294967264 }
0x1614   :  { %3971 = vsyncpa [#allocation6], 1 }

</bundles_post_ra>
